<compile_context>
chip_gen: v7x
topology: tpu7x:2x2x1
jax: 0.10.0
libtpu: 0.0.40
codegen_flags: <defaults>
</compile_context>

<pallas_src>
import functools
import math

import numpy as np
import jax
import jax.numpy as jnp
from jax import lax
from jax.experimental import pallas as pl
from jax.experimental.pallas import tpu as pltpu

_NEG_INF = -1e30


def _vmem_budget():
    """Per-generation VMEM budget in bytes (~80% of physical capacity)."""
    try:
        cap = pltpu.get_tpu_info().vmem_capacity_bytes
    except Exception:
        cap = 64 * 1024 * 1024          # conservative fallback (v7x-sized)
    return int(cap * 0.8)


def _pick_tile(dim, target, align):
    """Largest multiple of `align` dividing `dim` and <= target, else `dim`."""
    if dim <= target:
        return dim
    t = (target // align) * align
    while t >= align:
        if dim % t == 0:
            return t
        t -= align
    # No aligned divisor: fall back to a single full-dim block.  Footprint
    # checks in the callers turn an oversized block into a clear ValueError.
    return dim


# ---------------------------------------------------------------------------
# Tiled projection: o[p] = x @ w[p] + b[p]     (p = 0..P-1 stacked projections)
# ---------------------------------------------------------------------------
def _proj_kernel(x_ref, w_ref, b_ref, o_ref, acc_ref, *, mxu_dtype):
    k = pl.program_id(3)

    @pl.when(k == 0)
    def _init():
        acc_ref[...] = jnp.zeros_like(acc_ref)

    x = x_ref[...]
    w = w_ref[0]
    if mxu_dtype is not None:
        x = x.astype(mxu_dtype)
        w = w.astype(mxu_dtype)
    acc_ref[...] += jnp.dot(x, w, preferred_element_type=jnp.float32)

    @pl.when(k == pl.num_programs(3) - 1)
    def _finalize():
        o_ref[0] = (acc_ref[...] + b_ref[0].astype(jnp.float32)).astype(o_ref.dtype)


def _linear(x2d, w3, b3, *, tm=512, tn=512, tk=2048, mxu_dtype=None,
            vmem_budget=None):
    """x2d: [M, K] @ w3: [P, K, N] + b3: [P, 1, N] -> [P, M, N] (tiled, pipelined)."""
    M, K = x2d.shape
    P, _, N = w3.shape
    if vmem_budget is None:
        vmem_budget = _vmem_budget()

    tm = _pick_tile(M, tm, 8)
    tn = _pick_tile(N, tn, 128)
    tk = _pick_tile(K, tk, 128)

    isz = x2d.dtype.itemsize
    wsz = w3.dtype.itemsize
    footprint = (2 * tm * tk * isz          # x block, double-buffered
                 + 2 * tk * tn * wsz        # w block, double-buffered
                 + 2 * tm * tn * isz        # out block, double-buffered
                 + tm * tn * 4              # f32 accumulator
                 + 2 * 1 * tn * wsz)        # bias block
    if footprint > vmem_budget:
        raise ValueError(
            f"_linear tile footprint {footprint} B exceeds VMEM budget "
            f"{vmem_budget} B (M={M}, N={N}, K={K}, tiles=({tm},{tn},{tk}))")

    kernel = functools.partial(_proj_kernel, mxu_dtype=mxu_dtype)
    return pl.pallas_call(
        kernel,
        out_shape=jax.ShapeDtypeStruct((P, M, N), x2d.dtype),
        grid=(P, M // tm, N // tn, K // tk),
        in_specs=[
            pl.BlockSpec((tm, tk), lambda p, i, j, k: (i, k)),
            pl.BlockSpec((1, tk, tn), lambda p, i, j, k: (p, k, j)),
            pl.BlockSpec((1, 1, tn), lambda p, i, j, k: (p, 0, j)),
        ],
        out_specs=pl.BlockSpec((1, tm, tn), lambda p, i, j, k: (p, i, j)),
        scratch_shapes=[pltpu.VMEM((tm, tn), jnp.float32)],
        compiler_params=pltpu.CompilerParams(
            dimension_semantics=("parallel", "parallel", "parallel", "arbitrary"),
            vmem_limit_bytes=vmem_budget),
    )(x2d, w3, b3)


# ---------------------------------------------------------------------------
# Flash-style causal attention over a flattened triangular (q, kv) block grid
# ---------------------------------------------------------------------------
def _flash_attn_kernel(qt_ref, kt_ref, q_ref, k_ref, v_ref, o_ref,
                       m_sc, l_sc, acc_sc, *, t, num_heads, head_dim, mxu_dtype):
    """q/k/v blocks are (1, 1, t, C) slices of the packed [3, B, T, C] buffer.

    State (per-head m, l and the C-packed accumulator) is carried across the
    kv steps of one q block; output is written lane-dense at the diagonal block.
    """
    p = pl.program_id(1)
    qi = qt_ref[p]
    ki = kt_ref[p]

    @pl.when(ki == 0)
    def _init():
        m_sc[...] = jnp.full_like(m_sc, _NEG_INF)
        l_sc[...] = jnp.zeros_like(l_sc)
        acc_sc[...] = jnp.zeros_like(acc_sc)

    def _step(apply_mask):
        q2 = q_ref[0, 0]        # (t, C) — 1/sqrt(D) already folded into Q weights
        k2 = k_ref[0, 0]        # (t, C)
        v2 = v_ref[0, 0]        # (t, C)
        if apply_mask:
            # Diagonal block only (t_q == t_kv and qi == ki): local row >= col.
            row = lax.broadcasted_iota(jnp.int32, (t, t), 0)
            col = lax.broadcasted_iota(jnp.int32, (t, t), 1)
            visible = row >= col
        for h in range(num_heads):
            sl = slice(h * head_dim, (h + 1) * head_dim)
            q_h = q2[:, sl]
            k_h = k2[:, sl]
            v_h = v2[:, sl]
            if mxu_dtype is not None:
                q_h = q_h.astype(mxu_dtype)
                k_h = k_h.astype(mxu_dtype)
                v_h = v_h.astype(mxu_dtype)
            s = lax.dot_general(q_h, k_h, (((1,), (1,)), ((), ())),
                                preferred_element_type=jnp.float32)      # (t, t)
            if apply_mask:
                s = jnp.where(visible, s, _NEG_INF)
            m_prev = m_sc[h]                                              # (t, 1)
            m_new = jnp.maximum(m_prev, jnp.max(s, axis=-1, keepdims=True))
            alpha = jnp.exp(m_prev - m_new)
            pr = jnp.exp(s - m_new)
            l_sc[h] = alpha * l_sc[h] + jnp.sum(pr, axis=-1, keepdims=True)
            pv = lax.dot_general(pr.astype(v_h.dtype), v_h,
                                 (((1,), (0,)), ((), ())),
                                 preferred_element_type=jnp.float32)      # (t, D)
            acc_sc[:, sl] = alpha * acc_sc[:, sl] + pv
            m_sc[h] = m_new

    # Fully-visible block (strictly below the diagonal): no mask work at all.
    @pl.when(ki < qi)
    def _below_diag():
        _step(apply_mask=False)

    # Diagonal block: apply the causal mask, then finalize (it is always the
    # last kv step for this q block in the triangular enumeration).
    @pl.when(ki == qi)
    def _diag():
        _step(apply_mask=True)
        for h in range(num_heads):
            sl = slice(h * head_dim, (h + 1) * head_dim)
            l_h = l_sc[h]
            r = pl.reciprocal(l_h, approx=True)       # EUP slot
            inv = r * (2.0 - l_h * r)                  # one NR step -> ~f32 accuracy
            o_ref[0, :, sl] = (acc_sc[:, sl] * inv).astype(o_ref.dtype)


def _causal_attention(qkv3, B, T, C, num_heads, *, block_size=None,
                      mxu_dtype=None, vmem_budget=None):
    """qkv3: [3, B, T, C] (q pre-scaled) -> [B, T, C] causal attention output."""
    D = C // num_heads
    if vmem_budget is None:
        vmem_budget = _vmem_budget()
    isz = qkv3.dtype.itemsize

    def footprint(t):
        return (3 * 2 * t * C * isz                 # q/k/v blocks, double-buffered
                + 2 * t * C * isz                   # output block, double-buffered
                + t * C * 4                         # f32 packed accumulator
                + 2 * num_heads * t * 128 * 4)      # m/l scratch (lane-padded)

    if block_size is not None:
        t = block_size
    else:
        t = None
        for target in (1024, 512, 256, 128):
            cand = _pick_tile(T, target, 128)
            if footprint(cand) <= vmem_budget:
                t = cand
                break
        if t is None:
            raise ValueError(
                f"no attention block size fits VMEM budget {vmem_budget} B "
                f"(T={T}, C={C})")
    if T % t != 0:
        raise ValueError(f"attention block size {t} must divide T={T}")
    if footprint(t) > vmem_budget:
        raise ValueError(
            f"attention block footprint {footprint(t)} B exceeds VMEM budget "
            f"{vmem_budget} B (T={T}, C={C}, block={t})")

    # Triangular enumeration of causal (q block, kv block) pairs, kv innermost:
    # (0,0), (1,0), (1,1), (2,0), ...  — no dead (fully-masked) grid steps.
    nq = T // t
    qt = np.concatenate([np.full(i + 1, i, dtype=np.int32) for i in range(nq)])
    kt = np.concatenate([np.arange(i + 1, dtype=np.int32) for i in range(nq)])
    n_pairs = int(qt.shape[0])

    kernel = functools.partial(_flash_attn_kernel, t=t, num_heads=num_heads,
                               head_dim=D, mxu_dtype=mxu_dtype)

    grid_spec = pltpu.PrefetchScalarGridSpec(
        num_scalar_prefetch=2,
        grid=(B, n_pairs),
        in_specs=[
            pl.BlockSpec((1, 1, t, C), lambda b, p, qt_r, kt_r: (0, b, qt_r[p], 0)),
            pl.BlockSpec((1, 1, t, C), lambda b, p, qt_r, kt_r: (1, b, kt_r[p], 0)),
            pl.BlockSpec((1, 1, t, C), lambda b, p, qt_r, kt_r: (2, b, kt_r[p], 0)),
        ],
        out_specs=pl.BlockSpec((1, t, C), lambda b, p, qt_r, kt_r: (b, qt_r[p], 0)),
        scratch_shapes=[
            pltpu.VMEM((num_heads, t, 1), jnp.float32),   # running max   m
            pltpu.VMEM((num_heads, t, 1), jnp.float32),   # running sum   l
            pltpu.VMEM((t, C), jnp.float32),              # packed accumulator
        ],
    )

    return pl.pallas_call(
        kernel,
        out_shape=jax.ShapeDtypeStruct((B, T, C), qkv3.dtype),
        grid_spec=grid_spec,
        compiler_params=pltpu.CompilerParams(
            dimension_semantics=("parallel", "arbitrary"),
            vmem_limit_bytes=vmem_budget),
    )(jnp.asarray(qt), jnp.asarray(kt), qkv3, qkv3, qkv3)


# ---------------------------------------------------------------------------
# Parameter prep + full forward pass
# ---------------------------------------------------------------------------
def prepare_params(params, num_heads):
    """One-time prep: projection-major QKV layout + 1/sqrt(head_dim) folding."""
    C = params["w_proj"].shape[0]
    D = C // num_heads
    scale = jnp.float32(1.0 / math.sqrt(D))
    w_qkv = jnp.transpose(params["w_attn"].reshape(C, 3, C), (1, 0, 2))   # [3, C, C]
    b_qkv = params["b_attn"].reshape(3, 1, C)
    # Fold the attention scale into the Q projection -> kernel never rescales q.
    w_qkv = w_qkv.at[0].multiply(scale)
    b_qkv = b_qkv.at[0].multiply(scale)
    return {
        "w_qkv": w_qkv,
        "b_qkv": b_qkv,
        "w_proj": params["w_proj"].reshape(1, C, C),
        "b_proj": params["b_proj"].reshape(1, 1, C),
    }


def multihead_attention(x, prep, num_heads, *, attn_block=None, mxu_dtype=None):
    """Forward pass matching the PyTorch MultiheadAttention module (dropout=0).

    mxu_dtype: optionally cast MXU operands (e.g. jnp.bfloat16 on v6e/v7x);
    accumulation and softmax stay in f32.
    """
    B, T, C = x.shape
    assert C % num_heads == 0
    budget = _vmem_budget()

    # Fused QKV projection -> [3, B*T, C]   (q columns pre-scaled by 1/sqrt(D)).
    qkv = _linear(x.reshape(B * T, C), prep["w_qkv"], prep["b_qkv"],
                  mxu_dtype=mxu_dtype, vmem_budget=budget)
    qkv3 = qkv.reshape(3, B, T, C)          # free metadata reshape

    # Flash attention reads q/k/v directly from qkv3 via BlockSpecs and writes a
    # lane-dense [B, T, C] output (head packing done in VMEM inside the kernel).
    y = _causal_attention(qkv3, B, T, C, num_heads, block_size=attn_block,
                          mxu_dtype=mxu_dtype, vmem_budget=budget)

    # Output projection.
    out = _linear(y.reshape(B * T, C), prep["w_proj"], prep["b_proj"],
                  mxu_dtype=mxu_dtype, vmem_budget=budget)
    return out.reshape(B, T, C)
    # dropout (attn_dropout / res_dropout) is identity at dropout=0.0


# ---------------------------------------------------------------------------
# Params + pure-JAX reference
# ---------------------------------------------------------------------------
def init_params(key, embedding_dim):
    C = embedding_dim
    k1, k2, k3, k4 = jax.random.split(key, 4)
    bound = 1.0 / math.sqrt(C)
    return {
        # stored as [in, out] (transpose of torch's [out, in])
        "w_attn": jax.random.uniform(k1, (C, 3 * C), jnp.float32, -bound, bound),
        "b_attn": jax.random.uniform(k2, (3 * C,), jnp.float32, -bound, bound),
        "w_proj": jax.random.uniform(k3, (C, C), jnp.float32, -bound, bound),
        "b_proj": jax.random.uniform(k4, (C,), jnp.float32, -bound, bound),
    }


def _reference(x, params, num_heads):
    B, T, C = x.shape
    D = C // num_heads
    qkv = x.reshape(B * T, C) @ params["w_attn"] + params["b_attn"]
    q, k, v = jnp.split(qkv.reshape(B, T, 3 * C), 3, axis=2)
    q = q.reshape(B, T, num_heads, D).transpose(0, 2, 1, 3)
    k = k.reshape(B, T, num_heads, D).transpose(0, 2, 1, 3)
    v = v.reshape(B, T, num_heads, D).transpose(0, 2, 1, 3)
    s = jnp.einsum("bhqd,bhkd->bhqk", q, k) / math.sqrt(D)
    mask = jnp.tril(jnp.ones((T, T), bool))
    s = jnp.where(mask[None, None], s, -jnp.inf)
    att = jax.nn.softmax(s, axis=-1)
    y = jnp.einsum("bhqk,bhkd->bhqd", att, v)
    y = y.transpose(0, 2, 1, 3).reshape(B, T, C)
    return (y.reshape(B * T, C) @ params["w_proj"] + params["b_proj"]).reshape(B, T, C)


if __name__ == "__main__":
    fwd = jax.jit(multihead_attention,
                  static_argnames=("num_heads", "attn_block", "mxu_dtype"))

    # (B, T, C, H, attn_block)
    cases = [
        (2, 8, 32, 4, None),     # tiny shape from the spec (single-block path)
        (1, 512, 128, 4, None),  # single diagonal block, tiled GEMMs
        (2, 256, 64, 8, 128),    # multi-block triangular grid (masked + unmasked)
    ]
    key = jax.random.PRNGKey(0)
    for (B, T, C, H, blk) in cases:
        key, kx, kp = jax.random.split(key, 3)
        x = jax.random.normal(kx, (B, T, C), jnp.float32)
        params = init_params(kp, C)
        prep = prepare_params(params, H)

        out = jax.block_until_ready(fwd(x, prep, num_heads=H, attn_block=blk))
        ref = _reference(x, params, H)

        assert out.shape == (B, T, C)
        err = float(jnp.max(jnp.abs(out - ref)))
        assert jnp.allclose(out, ref, atol=2e-3, rtol=2e-3), (
            f"mismatch vs reference for B={B} T={T} C={C} H={H}: max abs err {err}")

    print("KERNEL_OK")
</pallas_src>

<mosaic_0001>
module attributes {stable_mosaic.version = 11 : i64} {
  func.func @_proj_kernel(%arg0: i32, %arg1: i32, %arg2: i32, %arg3: i32, %arg4: memref<16x32xf32, #tpu.memory_space<vmem>>, %arg5: memref<1x32x32xf32, #tpu.memory_space<vmem>>, %arg6: memref<1x1x32xf32, #tpu.memory_space<vmem>>, %arg7: memref<1x16x32xf32, #tpu.memory_space<vmem>>, %arg8: memref<16x32xf32, #tpu.memory_space<vmem>>) attributes {dimension_semantics = [#tpu.dimension_semantics<parallel>, #tpu.dimension_semantics<parallel>, #tpu.dimension_semantics<parallel>, #tpu.dimension_semantics<arbitrary>], iteration_bounds = array<i64: 1, 1, 1, 1>, scalar_prefetch = 0 : i64, scratch_operands = 1 : i64, tpu.core_type = #tpu.core_type<tc>, window_params = [{transform_indices = @transform_0, window_bounds = array<i64: 16, 32>}, {transform_indices = @transform_1, window_bounds = array<i64: 1, 32, 32>}, {transform_indices = @transform_2, window_bounds = array<i64: 1, 1, 32>}, {transform_indices = @transform_3, window_bounds = array<i64: 1, 16, 32>}]} {
    %c0_i32 = arith.constant 0 : i32
    %0 = arith.cmpi eq, %arg3, %c0_i32 : i32
    %1 = arith.extui %0 : i1 to i32
    %c0_i32_0 = arith.constant 0 : i32
    %2 = arith.cmpi ne, %1, %c0_i32_0 : i32
    scf.if %2 {
      %cst_11 = arith.constant 0.000000e+00 : f32
      %13 = vector.broadcast %cst_11 : f32 to vector<16x32xf32>
      %c0_12 = arith.constant 0 : index
      %c0_13 = arith.constant 0 : index
      %14 = vector.load %arg8[%c0_12, %c0_13] : memref<16x32xf32, #tpu.memory_space<vmem>>, vector<16x32xf32>
      tpu.vector_store %arg8[%c0_12, %c0_13], %13 {strides = array<i32>} : memref<16x32xf32, #tpu.memory_space<vmem>>, vector<16x32xf32>,
    } else {
    }
    %c0 = arith.constant 0 : index
    %c0_1 = arith.constant 0 : index
    %3 = vector.load %arg4[%c0, %c0_1] : memref<16x32xf32, #tpu.memory_space<vmem>>, vector<16x32xf32>
    %c0_2 = arith.constant 0 : index
    %c0_3 = arith.constant 0 : index
    %c0_4 = arith.constant 0 : index
    %4 = vector.load %arg5[%c0_2, %c0_3, %c0_4] : memref<1x32x32xf32, #tpu.memory_space<vmem>>, vector<1x32x32xf32>
    %5 = vector.shape_cast %4 : vector<1x32x32xf32> to vector<32x32xf32>
    %c0_5 = arith.constant 0 : index
    %c0_6 = arith.constant 0 : index
    %6 = vector.load %arg8[%c0_5, %c0_6] : memref<16x32xf32, #tpu.memory_space<vmem>>, vector<16x32xf32>
    %cst = arith.constant dense<0.000000e+00> : vector<16x32xf32>
    %7 = tpu.matmul %3, %5, %cst {dimension_numbers = #tpu.dot_dimension_numbers<[1], [0], [0], [1], [0, 0, 1, 1], [], []>} : vector<16x32xf32>, vector<32x32xf32>, vector<16x32xf32> -> vector<16x32xf32>
    %8 = arith.addf %6, %7 : vector<16x32xf32>
    %c0_7 = arith.constant 0 : index
    %c0_8 = arith.constant 0 : index
    %9 = vector.load %arg8[%c0_7, %c0_8] : memref<16x32xf32, #tpu.memory_space<vmem>>, vector<16x32xf32>
    tpu.vector_store %arg8[%c0_7, %c0_8], %8 {strides = array<i32>} : memref<16x32xf32, #tpu.memory_space<vmem>>, vector<16x32xf32>,
    %c0_i32_9 = arith.constant 0 : i32
    %10 = arith.cmpi eq, %arg3, %c0_i32_9 : i32
    %11 = arith.extui %10 : i1 to i32
    %c0_i32_10 = arith.constant 0 : i32
    %12 = arith.cmpi ne, %11, %c0_i32_10 : i32
    scf.if %12 {
      %c0_11 = arith.constant 0 : index
      %c0_12 = arith.constant 0 : index
      %13 = vector.load %arg8[%c0_11, %c0_12] : memref<16x32xf32, #tpu.memory_space<vmem>>, vector<16x32xf32>
      %c0_13 = arith.constant 0 : index
      %c0_14 = arith.constant 0 : index
      %c0_15 = arith.constant 0 : index
      %14 = vector.load %arg6[%c0_13, %c0_14, %c0_15] : memref<1x1x32xf32, #tpu.memory_space<vmem>>, vector<1x1x32xf32>
      %15 = vector.shape_cast %14 : vector<1x1x32xf32> to vector<1x32xf32>
      %16 = vector.broadcast %15 : vector<1x32xf32> to vector<16x32xf32>
      %17 = arith.addf %13, %16 : vector<16x32xf32>
      %c0_16 = arith.constant 0 : index
      %c0_17 = arith.constant 0 : index
      %c0_18 = arith.constant 0 : index
      %18 = vector.load %arg7[%c0_16, %c0_17, %c0_18] : memref<1x16x32xf32, #tpu.memory_space<vmem>>, vector<1x16x32xf32>
      %19 = vector.shape_cast %18 : vector<1x16x32xf32> to vector<16x32xf32>
      %20 = vector.shape_cast %17 : vector<16x32xf32> to vector<1x16x32xf32>
      tpu.vector_store %arg7[%c0_16, %c0_17, %c0_18], %20 {strides = array<i32>} : memref<1x16x32xf32, #tpu.memory_space<vmem>>, vector<1x16x32xf32>,
    } else {
    }
    return
  }
  func.func @transform_0(%arg0: i32, %arg1: i32, %arg2: i32, %arg3: i32) -> (i32, i32) {
    %c0_i32 = arith.constant 0 : i32
    return %arg1, %arg3 : i32, i32
  }
  func.func @transform_1(%arg0: i32, %arg1: i32, %arg2: i32, %arg3: i32) -> (i32, i32, i32) {
    %c0_i32 = arith.constant 0 : i32
    return %arg0, %arg3, %arg2 : i32, i32, i32
  }
  func.func @transform_2(%arg0: i32, %arg1: i32, %arg2: i32, %arg3: i32) -> (i32, i32, i32) {
    %c0_i32 = arith.constant 0 : i32
    %c0_i32_0 = arith.constant 0 : i32
    return %arg0, %c0_i32, %arg2 : i32, i32, i32
  }
  func.func @transform_3(%arg0: i32, %arg1: i32, %arg2: i32, %arg3: i32) -> (i32, i32, i32) {
    %c0_i32 = arith.constant 0 : i32
    return %arg0, %arg1, %arg2 : i32, i32, i32
  }
}

module attributes {stable_mosaic.version = 11 : i64} {
  func.func @_proj_kernel(%arg0: i32, %arg1: i32, %arg2: i32, %arg3: i32, %arg4: memref<16x32xf32, #tpu.memory_space<vmem>>, %arg5: memref<1x32x32xf32, #tpu.memory_space<vmem>>, %arg6: memref<1x1x32xf32, #tpu.memory_space<vmem>>, %arg7: memref<1x16x32xf32, #tpu.memory_space<vmem>>, %arg8: memref<16x32xf32, #tpu.memory_space<vmem>>) attributes {dimension_semantics = [#tpu.dimension_semantics<parallel>, #tpu.dimension_semantics<parallel>, #tpu.dimension_semantics<parallel>, #tpu.dimension_semantics<arbitrary>], iteration_bounds = array<i64: 3, 1, 1, 1>, scalar_prefetch = 0 : i64, scratch_operands = 1 : i64, tpu.core_type = #tpu.core_type<tc>, window_params = [{transform_indices = @transform_0, window_bounds = array<i64: 16, 32>}, {transform_indices = @transform_1, window_bounds = array<i64: 1, 32, 32>}, {transform_indices = @transform_2, window_bounds = array<i64: 1, 1, 32>}, {transform_indices = @transform_3, window_bounds = array<i64: 1, 16, 32>}]} {
    %c0_i32 = arith.constant 0 : i32
    %0 = arith.cmpi eq, %arg3, %c0_i32 : i32
    %1 = arith.extui %0 : i1 to i32
    %c0_i32_0 = arith.constant 0 : i32
    %2 = arith.cmpi ne, %1, %c0_i32_0 : i32
    scf.if %2 {
      %cst_11 = arith.constant 0.000000e+00 : f32
      %13 = vector.broadcast %cst_11 : f32 to vector<16x32xf32>
      %c0_12 = arith.constant 0 : index
      %c0_13 = arith.constant 0 : index
      %14 = vector.load %arg8[%c0_12, %c0_13] : memref<16x32xf32, #tpu.memory_space<vmem>>, vector<16x32xf32>
      tpu.vector_store %arg8[%c0_12, %c0_13], %13 {strides = array<i32>} : memref<16x32xf32, #tpu.memory_space<vmem>>, vector<16x32xf32>,
    } else {
    }
    %c0 = arith.constant 0 : index
    %c0_1 = arith.constant 0 : index
    %3 = vector.load %arg4[%c0, %c0_1] : memref<16x32xf32, #tpu.memory_space<vmem>>, vector<16x32xf32>
    %c0_2 = arith.constant 0 : index
    %c0_3 = arith.constant 0 : index
    %c0_4 = arith.constant 0 : index
    %4 = vector.load %arg5[%c0_2, %c0_3, %c0_4] : memref<1x32x32xf32, #tpu.memory_space<vmem>>, vector<1x32x32xf32>
    %5 = vector.shape_cast %4 : vector<1x32x32xf32> to vector<32x32xf32>
    %c0_5 = arith.constant 0 : index
    %c0_6 = arith.constant 0 : index
    %6 = vector.load %arg8[%c0_5, %c0_6] : memref<16x32xf32, #tpu.memory_space<vmem>>, vector<16x32xf32>
    %cst = arith.constant dense<0.000000e+00> : vector<16x32xf32>
    %7 = tpu.matmul %3, %5, %cst {dimension_numbers = #tpu.dot_dimension_numbers<[1], [0], [0], [1], [0, 0, 1, 1], [], []>} : vector<16x32xf32>, vector<32x32xf32>, vector<16x32xf32> -> vector<16x32xf32>
    %8 = arith.addf %6, %7 : vector<16x32xf32>
    %c0_7 = arith.constant 0 : index
    %c0_8 = arith.constant 0 : index
    %9 = vector.load %arg8[%c0_7, %c0_8] : memref<16x32xf32, #tpu.memory_space<vmem>>, vector<16x32xf32>
    tpu.vector_store %arg8[%c0_7, %c0_8], %8 {strides = array<i32>} : memref<16x32xf32, #tpu.memory_space<vmem>>, vector<16x32xf32>,
    %c0_i32_9 = arith.constant 0 : i32
    %10 = arith.cmpi eq, %arg3, %c0_i32_9 : i32
    %11 = arith.extui %10 : i1 to i32
    %c0_i32_10 = arith.constant 0 : i32
    %12 = arith.cmpi ne, %11, %c0_i32_10 : i32
    scf.if %12 {
      %c0_11 = arith.constant 0 : index
      %c0_12 = arith.constant 0 : index
      %13 = vector.load %arg8[%c0_11, %c0_12] : memref<16x32xf32, #tpu.memory_space<vmem>>, vector<16x32xf32>
      %c0_13 = arith.constant 0 : index
      %c0_14 = arith.constant 0 : index
      %c0_15 = arith.constant 0 : index
      %14 = vector.load %arg6[%c0_13, %c0_14, %c0_15] : memref<1x1x32xf32, #tpu.memory_space<vmem>>, vector<1x1x32xf32>
      %15 = vector.shape_cast %14 : vector<1x1x32xf32> to vector<1x32xf32>
      %16 = vector.broadcast %15 : vector<1x32xf32> to vector<16x32xf32>
      %17 = arith.addf %13, %16 : vector<16x32xf32>
      %c0_16 = arith.constant 0 : index
      %c0_17 = arith.constant 0 : index
      %c0_18 = arith.constant 0 : index
      %18 = vector.load %arg7[%c0_16, %c0_17, %c0_18] : memref<1x16x32xf32, #tpu.memory_space<vmem>>, vector<1x16x32xf32>
      %19 = vector.shape_cast %18 : vector<1x16x32xf32> to vector<16x32xf32>
      %20 = vector.shape_cast %17 : vector<16x32xf32> to vector<1x16x32xf32>
      tpu.vector_store %arg7[%c0_16, %c0_17, %c0_18], %20 {strides = array<i32>} : memref<1x16x32xf32, #tpu.memory_space<vmem>>, vector<1x16x32xf32>,
    } else {
    }
    return
  }
  func.func @transform_0(%arg0: i32, %arg1: i32, %arg2: i32, %arg3: i32) -> (i32, i32) {
    %c0_i32 = arith.constant 0 : i32
    return %arg1, %arg3 : i32, i32
  }
  func.func @transform_1(%arg0: i32, %arg1: i32, %arg2: i32, %arg3: i32) -> (i32, i32, i32) {
    %c0_i32 = arith.constant 0 : i32
    return %arg0, %arg3, %arg2 : i32, i32, i32
  }
  func.func @transform_2(%arg0: i32, %arg1: i32, %arg2: i32, %arg3: i32) -> (i32, i32, i32) {
    %c0_i32 = arith.constant 0 : i32
    %c0_i32_0 = arith.constant 0 : i32
    return %arg0, %c0_i32, %arg2 : i32, i32, i32
  }
  func.func @transform_3(%arg0: i32, %arg1: i32, %arg2: i32, %arg3: i32) -> (i32, i32, i32) {
    %c0_i32 = arith.constant 0 : i32
    return %arg0, %arg1, %arg2 : i32, i32, i32
  }
}

module attributes {stable_mosaic.version = 11 : i64} {
  func.func @_flash_attn_kernel(%arg0: i32, %arg1: i32, %arg2: memref<1xi32, #tpu.memory_space<smem>>, %arg3: memref<1xi32, #tpu.memory_space<smem>>, %arg4: memref<1x1x8x32xf32, #tpu.memory_space<vmem>>, %arg5: memref<1x1x8x32xf32, #tpu.memory_space<vmem>>, %arg6: memref<1x1x8x32xf32, #tpu.memory_space<vmem>>, %arg7: memref<1x8x32xf32, #tpu.memory_space<vmem>>, %arg8: memref<4x8x1xf32, #tpu.memory_space<vmem>>, %arg9: memref<4x8x1xf32, #tpu.memory_space<vmem>>, %arg10: memref<8x32xf32, #tpu.memory_space<vmem>>) attributes {dimension_semantics = [#tpu.dimension_semantics<parallel>, #tpu.dimension_semantics<arbitrary>], iteration_bounds = array<i64: 2, 1>, scalar_prefetch = 2 : i64, scratch_operands = 3 : i64, tpu.core_type = #tpu.core_type<tc>, window_params = [{transform_indices = @transform_0, window_bounds = array<i64: 1, 1, 8, 32>}, {transform_indices = @transform_1, window_bounds = array<i64: 1, 1, 8, 32>}, {transform_indices = @transform_2, window_bounds = array<i64: 1, 1, 8, 32>}, {transform_indices = @transform_3, window_bounds = array<i64: 1, 8, 32>}]} {
    %0 = arith.index_cast %arg1 : i32 to index
    %1 = memref.load %arg2[%0] : memref<1xi32, #tpu.memory_space<smem>>
    %2 = arith.index_cast %arg1 : i32 to index
    %3 = memref.load %arg3[%2] : memref<1xi32, #tpu.memory_space<smem>>
    %c0_i32 = arith.constant 0 : i32
    %4 = arith.cmpi eq, %3, %c0_i32 : i32
    %5 = arith.extui %4 : i1 to i32
    %c0_i32_0 = arith.constant 0 : i32
    %6 = arith.cmpi ne, %5, %c0_i32_0 : i32
    scf.if %6 {
      %cst = arith.constant -1.000000e+30 : f32
      %13 = vector.broadcast %cst : f32 to vector<4x8x1xf32>
      %c0 = arith.constant 0 : index
      %c0_3 = arith.constant 0 : index
      %c0_4 = arith.constant 0 : index
      %14 = vector.load %arg8[%c0, %c0_3, %c0_4] : memref<4x8x1xf32, #tpu.memory_space<vmem>>, vector<4x8x1xf32>
      tpu.vector_store %arg8[%c0, %c0_3, %c0_4], %13 {strides = array<i32>} : memref<4x8x1xf32, #tpu.memory_space<vmem>>, vector<4x8x1xf32>,
      %cst_5 = arith.constant 0.000000e+00 : f32
      %15 = vector.broadcast %cst_5 : f32 to vector<4x8x1xf32>
      %c0_6 = arith.constant 0 : index
      %c0_7 = arith.constant 0 : index
      %c0_8 = arith.constant 0 : index
      %16 = vector.load %arg9[%c0_6, %c0_7, %c0_8] : memref<4x8x1xf32, #tpu.memory_space<vmem>>, vector<4x8x1xf32>
      tpu.vector_store %arg9[%c0_6, %c0_7, %c0_8], %15 {strides = array<i32>} : memref<4x8x1xf32, #tpu.memory_space<vmem>>, vector<4x8x1xf32>,
      %cst_9 = arith.constant 0.000000e+00 : f32
      %17 = vector.broadcast %cst_9 : f32 to vector<8x32xf32>
      %c0_10 = arith.constant 0 : index
      %c0_11 = arith.constant 0 : index
      %18 = vector.load %arg10[%c0_10, %c0_11] : memref<8x32xf32, #tpu.memory_space<vmem>>, vector<8x32xf32>
      tpu.vector_store %arg10[%c0_10, %c0_11], %17 {strides = array<i32>} : memref<8x32xf32, #tpu.memory_space<vmem>>, vector<8x32xf32>,
    } else {
    }
    %7 = arith.cmpi slt, %3, %1 : i32
    %8 = arith.extui %7 : i1 to i32
    %c0_i32_1 = arith.constant 0 : i32
    %9 = arith.cmpi ne, %8, %c0_i32_1 : i32
    scf.if %9 {
      %c0 = arith.constant 0 : index
      %c0_3 = arith.constant 0 : index
      %c0_4 = arith.constant 0 : index
      %c0_5 = arith.constant 0 : index
      %13 = vector.load %arg4[%c0, %c0_3, %c0_4, %c0_5] : memref<1x1x8x32xf32, #tpu.memory_space<vmem>>, vector<1x1x8x32xf32>
      %14 = vector.shape_cast %13 : vector<1x1x8x32xf32> to vector<8x32xf32>
      %c0_6 = arith.constant 0 : index
      %c0_7 = arith.constant 0 : index
      %c0_8 = arith.constant 0 : index
      %c0_9 = arith.constant 0 : index
      %15 = vector.load %arg5[%c0_6, %c0_7, %c0_8, %c0_9] : memref<1x1x8x32xf32, #tpu.memory_space<vmem>>, vector<1x1x8x32xf32>
      %16 = vector.shape_cast %15 : vector<1x1x8x32xf32> to vector<8x32xf32>
      %c0_10 = arith.constant 0 : index
      %c0_11 = arith.constant 0 : index
      %c0_12 = arith.constant 0 : index
      %c0_13 = arith.constant 0 : index
      %17 = vector.load %arg6[%c0_10, %c0_11, %c0_12, %c0_13] : memref<1x1x8x32xf32, #tpu.memory_space<vmem>>, vector<1x1x8x32xf32>
      %18 = vector.shape_cast %17 : vector<1x1x8x32xf32> to vector<8x32xf32>
      %19 = vector.extract_strided_slice %14 {offsets = [0, 0], sizes = [8, 8], strides = [1, 1]} : vector<8x32xf32> to vector<8x8xf32>
      %20 = vector.extract_strided_slice %16 {offsets = [0, 0], sizes = [8, 8], strides = [1, 1]} : vector<8x32xf32> to vector<8x8xf32>
      %21 = vector.extract_strided_slice %18 {offsets = [0, 0], sizes = [8, 8], strides = [1, 1]} : vector<8x32xf32> to vector<8x8xf32>
      %cst = arith.constant dense<0.000000e+00> : vector<8x8xf32>
      %22 = tpu.matmul %19, %20, %cst {dimension_numbers = #tpu.dot_dimension_numbers<[1], [1], [0], [0], [0, 0, 1, 0], [], []>} : vector<8x8xf32>, vector<8x8xf32>, vector<8x8xf32> -> vector<8x8xf32>
      %c0_14 = arith.constant 0 : index
      %c0_15 = arith.constant 0 : index
      %c0_16 = arith.constant 0 : index
      %23 = vector.load %arg8[%c0_14, %c0_15, %c0_16] : memref<4x8x1xf32, #tpu.memory_space<vmem>>, vector<1x8x1xf32>
      %24 = vector.shape_cast %23 : vector<1x8x1xf32> to vector<8x1xf32>
      %cst_17 = arith.constant dense<0xFF800000> : vector<8xf32>
      %25 = vector.multi_reduction <maximumf>, %22, %cst_17 [1] : vector<8x8xf32> to vector<8xf32>
      %26 = vector.shape_cast %25 : vector<8xf32> to vector<8x1xf32>
      %27 = arith.maximumf %24, %26 : vector<8x1xf32>
      %28 = arith.subf %24, %27 : vector<8x1xf32>
      %29 = math.exp %28 : vector<8x1xf32>
      %30 = vector.broadcast %27 : vector<8x1xf32> to vector<8x8xf32>
      %31 = arith.subf %22, %30 : vector<8x8xf32>
      %32 = math.exp %31 : vector<8x8xf32>
      %c0_18 = arith.constant 0 : index
      %c0_19 = arith.constant 0 : index
      %c0_20 = arith.constant 0 : index
      %33 = vector.load %arg9[%c0_18, %c0_19, %c0_20] : memref<4x8x1xf32, #tpu.memory_space<vmem>>, vector<1x8x1xf32>
      %34 = vector.shape_cast %33 : vector<1x8x1xf32> to vector<8x1xf32>
      %35 = arith.mulf %29, %34 : vector<8x1xf32>
      %cst_21 = arith.constant dense<0.000000e+00> : vector<8xf32>
      %36 = vector.multi_reduction <add>, %32, %cst_21 [1] : vector<8x8xf32> to vector<8xf32>
      %37 = vector.shape_cast %36 : vector<8xf32> to vector<8x1xf32>
      %38 = arith.addf %35, %37 : vector<8x1xf32>
      %c0_22 = arith.constant 0 : index
      %c0_23 = arith.constant 0 : index
      %c0_24 = arith.constant 0 : index
      %39 = vector.load %arg9[%c0_22, %c0_23, %c0_24] : memref<4x8x1xf32, #tpu.memory_space<vmem>>, vector<1x8x1xf32>
      %40 = vector.shape_cast %39 : vector<1x8x1xf32> to vector<8x1xf32>
      %41 = vector.shape_cast %38 : vector<8x1xf32> to vector<1x8x1xf32>
      tpu.vector_store %arg9[%c0_22, %c0_23, %c0_24], %41 {strides = array<i32>} : memref<4x8x1xf32, #tpu.memory_space<vmem>>, vector<1x8x1xf32>,
      %cst_25 = arith.constant dense<0.000000e+00> : vector<8x8xf32>
      %42 = tpu.matmul %32, %21, %cst_25 {dimension_numbers = #tpu.dot_dimension_numbers<[1], [0], [0], [1], [0, 0, 1, 1], [], []>} : vector<8x8xf32>, vector<8x8xf32>, vector<8x8xf32> -> vector<8x8xf32>
      %c0_26 = arith.constant 0 : index
      %c0_27 = arith.constant 0 : index
      %43 = vector.load %arg10[%c0_26, %c0_27] : memref<8x32xf32, #tpu.memory_space<vmem>>, vector<8x8xf32>
      %44 = vector.broadcast %29 : vector<8x1xf32> to vector<8x8xf32>
      %45 = arith.mulf %44, %43 : vector<8x8xf32>
      %46 = arith.addf %45, %42 : vector<8x8xf32>
      %c0_28 = arith.constant 0 : index
      %c0_29 = arith.constant 0 : index
      %47 = vector.load %arg10[%c0_28, %c0_29] : memref<8x32xf32, #tpu.memory_space<vmem>>, vector<8x8xf32>
      tpu.vector_store %arg10[%c0_28, %c0_29], %46 {strides = array<i32>} : memref<8x32xf32, #tpu.memory_space<vmem>>, vector<8x8xf32>,
      %c0_30 = arith.constant 0 : index
      %c0_31 = arith.constant 0 : index
      %c0_32 = arith.constant 0 : index
      %48 = vector.load %arg8[%c0_30, %c0_31, %c0_32] : memref<4x8x1xf32, #tpu.memory_space<vmem>>, vector<1x8x1xf32>
      %49 = vector.shape_cast %48 : vector<1x8x1xf32> to vector<8x1xf32>
      %50 = vector.shape_cast %27 : vector<8x1xf32> to vector<1x8x1xf32>
      tpu.vector_store %arg8[%c0_30, %c0_31, %c0_32], %50 {strides = array<i32>} : memref<4x8x1xf32, #tpu.memory_space<vmem>>, vector<1x8x1xf32>,
      %51 = vector.extract_strided_slice %14 {offsets = [0, 8], sizes = [8, 8], strides = [1, 1]} : vector<8x32xf32> to vector<8x8xf32>
      %52 = vector.extract_strided_slice %16 {offsets = [0, 8], sizes = [8, 8], strides = [1, 1]} : vector<8x32xf32> to vector<8x8xf32>
      %53 = vector.extract_strided_slice %18 {offsets = [0, 8], sizes = [8, 8], strides = [1, 1]} : vector<8x32xf32> to vector<8x8xf32>
      %cst_33 = arith.constant dense<0.000000e+00> : vector<8x8xf32>
      %54 = tpu.matmul %51, %52, %cst_33 {dimension_numbers = #tpu.dot_dimension_numbers<[1], [1], [0], [0], [0, 0, 1, 0], [], []>} : vector<8x8xf32>, vector<8x8xf32>, vector<8x8xf32> -> vector<8x8xf32>
      %c1 = arith.constant 1 : index
      %c0_34 = arith.constant 0 : index
      %c0_35 = arith.constant 0 : index
      %55 = vector.load %arg8[%c1, %c0_34, %c0_35] : memref<4x8x1xf32, #tpu.memory_space<vmem>>, vector<1x8x1xf32>
      %56 = vector.shape_cast %55 : vector<1x8x1xf32> to vector<8x1xf32>
      %cst_36 = arith.constant dense<0xFF800000> : vector<8xf32>
      %57 = vector.multi_reduction <maximumf>, %54, %cst_36 [1] : vector<8x8xf32> to vector<8xf32>
      %58 = vector.shape_cast %57 : vector<8xf32> to vector<8x1xf32>
      %59 = arith.maximumf %56, %58 : vector<8x1xf32>
      %60 = arith.subf %56, %59 : vector<8x1xf32>
      %61 = math.exp %60 : vector<8x1xf32>
      %62 = vector.broadcast %59 : vector<8x1xf32> to vector<8x8xf32>
      %63 = arith.subf %54, %62 : vector<8x8xf32>
      %64 = math.exp %63 : vector<8x8xf32>
      %c1_37 = arith.constant 1 : index
      %c0_38 = arith.constant 0 : index
      %c0_39 = arith.constant 0 : index
      %65 = vector.load %arg9[%c1_37, %c0_38, %c0_39] : memref<4x8x1xf32, #tpu.memory_space<vmem>>, vector<1x8x1xf32>
      %66 = vector.shape_cast %65 : vector<1x8x1xf32> to vector<8x1xf32>
      %67 = arith.mulf %61, %66 : vector<8x1xf32>
      %cst_40 = arith.constant dense<0.000000e+00> : vector<8xf32>
      %68 = vector.multi_reduction <add>, %64, %cst_40 [1] : vector<8x8xf32> to vector<8xf32>
      %69 = vector.shape_cast %68 : vector<8xf32> to vector<8x1xf32>
      %70 = arith.addf %67, %69 : vector<8x1xf32>
      %c1_41 = arith.constant 1 : index
      %c0_42 = arith.constant 0 : index
      %c0_43 = arith.constant 0 : index
      %71 = vector.load %arg9[%c1_41, %c0_42, %c0_43] : memref<4x8x1xf32, #tpu.memory_space<vmem>>, vector<1x8x1xf32>
      %72 = vector.shape_cast %71 : vector<1x8x1xf32> to vector<8x1xf32>
      %73 = vector.shape_cast %70 : vector<8x1xf32> to vector<1x8x1xf32>
      tpu.vector_store %arg9[%c1_41, %c0_42, %c0_43], %73 {strides = array<i32>} : memref<4x8x1xf32, #tpu.memory_space<vmem>>, vector<1x8x1xf32>,
      %cst_44 = arith.constant dense<0.000000e+00> : vector<8x8xf32>
      %74 = tpu.matmul %64, %53, %cst_44 {dimension_numbers = #tpu.dot_dimension_numbers<[1], [0], [0], [1], [0, 0, 1, 1], [], []>} : vector<8x8xf32>, vector<8x8xf32>, vector<8x8xf32> -> vector<8x8xf32>
      %c0_45 = arith.constant 0 : index
      %c8 = arith.constant 8 : index
      %75 = vector.load %arg10[%c0_45, %c8] : memref<8x32xf32, #tpu.memory_space<vmem>>, vector<8x8xf32>
      %76 = vector.broadcast %61 : vector<8x1xf32> to vector<8x8xf32>
      %77 = arith.mulf %76, %75 : vector<8x8xf32>
      %78 = arith.addf %77, %74 : vector<8x8xf32>
      %c0_46 = arith.constant 0 : index
      %c8_47 = arith.constant 8 : index
      %79 = vector.load %arg10[%c0_46, %c8_47] : memref<8x32xf32, #tpu.memory_space<vmem>>, vector<8x8xf32>
      tpu.vector_store %arg10[%c0_46, %c8_47], %78 {strides = array<i32>} : memref<8x32xf32, #tpu.memory_space<vmem>>, vector<8x8xf32>,
      %c1_48 = arith.constant 1 : index
      %c0_49 = arith.constant 0 : index
      %c0_50 = arith.constant 0 : index
      %80 = vector.load %arg8[%c1_48, %c0_49, %c0_50] : memref<4x8x1xf32, #tpu.memory_space<vmem>>, vector<1x8x1xf32>
      %81 = vector.shape_cast %80 : vector<1x8x1xf32> to vector<8x1xf32>
      %82 = vector.shape_cast %59 : vector<8x1xf32> to vector<1x8x1xf32>
      tpu.vector_store %arg8[%c1_48, %c0_49, %c0_50], %82 {strides = array<i32>} : memref<4x8x1xf32, #tpu.memory_space<vmem>>, vector<1x8x1xf32>,
      %83 = vector.extract_strided_slice %14 {offsets = [0, 16], sizes = [8, 8], strides = [1, 1]} : vector<8x32xf32> to vector<8x8xf32>
      %84 = vector.extract_strided_slice %16 {offsets = [0, 16], sizes = [8, 8], strides = [1, 1]} : vector<8x32xf32> to vector<8x8xf32>
      %85 = vector.extract_strided_slice %18 {offsets = [0, 16], sizes = [8, 8], strides = [1, 1]} : vector<8x32xf32> to vector<8x8xf32>
      %cst_51 = arith.constant dense<0.000000e+00> : vector<8x8xf32>
      %86 = tpu.matmul %83, %84, %cst_51 {dimension_numbers = #tpu.dot_dimension_numbers<[1], [1], [0], [0], [0, 0, 1, 0], [], []>} : vector<8x8xf32>, vector<8x8xf32>, vector<8x8xf32> -> vector<8x8xf32>
      %c2 = arith.constant 2 : index
      %c0_52 = arith.constant 0 : index
      %c0_53 = arith.constant 0 : index
      %87 = vector.load %arg8[%c2, %c0_52, %c0_53] : memref<4x8x1xf32, #tpu.memory_space<vmem>>, vector<1x8x1xf32>
      %88 = vector.shape_cast %87 : vector<1x8x1xf32> to vector<8x1xf32>
      %cst_54 = arith.constant dense<0xFF800000> : vector<8xf32>
      %89 = vector.multi_reduction <maximumf>, %86, %cst_54 [1] : vector<8x8xf32> to vector<8xf32>
      %90 = vector.shape_cast %89 : vector<8xf32> to vector<8x1xf32>
      %91 = arith.maximumf %88, %90 : vector<8x1xf32>
      %92 = arith.subf %88, %91 : vector<8x1xf32>
      %93 = math.exp %92 : vector<8x1xf32>
      %94 = vector.broadcast %91 : vector<8x1xf32> to vector<8x8xf32>
      %95 = arith.subf %86, %94 : vector<8x8xf32>
      %96 = math.exp %95 : vector<8x8xf32>
      %c2_55 = arith.constant 2 : index
      %c0_56 = arith.constant 0 : index
      %c0_57 = arith.constant 0 : index
      %97 = vector.load %arg9[%c2_55, %c0_56, %c0_57] : memref<4x8x1xf32, #tpu.memory_space<vmem>>, vector<1x8x1xf32>
      %98 = vector.shape_cast %97 : vector<1x8x1xf32> to vector<8x1xf32>
      %99 = arith.mulf %93, %98 : vector<8x1xf32>
      %cst_58 = arith.constant dense<0.000000e+00> : vector<8xf32>
      %100 = vector.multi_reduction <add>, %96, %cst_58 [1] : vector<8x8xf32> to vector<8xf32>
      %101 = vector.shape_cast %100 : vector<8xf32> to vector<8x1xf32>
      %102 = arith.addf %99, %101 : vector<8x1xf32>
      %c2_59 = arith.constant 2 : index
      %c0_60 = arith.constant 0 : index
      %c0_61 = arith.constant 0 : index
      %103 = vector.load %arg9[%c2_59, %c0_60, %c0_61] : memref<4x8x1xf32, #tpu.memory_space<vmem>>, vector<1x8x1xf32>
      %104 = vector.shape_cast %103 : vector<1x8x1xf32> to vector<8x1xf32>
      %105 = vector.shape_cast %102 : vector<8x1xf32> to vector<1x8x1xf32>
      tpu.vector_store %arg9[%c2_59, %c0_60, %c0_61], %105 {strides = array<i32>} : memref<4x8x1xf32, #tpu.memory_space<vmem>>, vector<1x8x1xf32>,
      %cst_62 = arith.constant dense<0.000000e+00> : vector<8x8xf32>
      %106 = tpu.matmul %96, %85, %cst_62 {dimension_numbers = #tpu.dot_dimension_numbers<[1], [0], [0], [1], [0, 0, 1, 1], [], []>} : vector<8x8xf32>, vector<8x8xf32>, vector<8x8xf32> -> vector<8x8xf32>
      %c0_63 = arith.constant 0 : index
      %c16 = arith.constant 16 : index
      %107 = vector.load %arg10[%c0_63, %c16] : memref<8x32xf32, #tpu.memory_space<vmem>>, vector<8x8xf32>
      %108 = vector.broadcast %93 : vector<8x1xf32> to vector<8x8xf32>
      %109 = arith.mulf %108, %107 : vector<8x8xf32>
      %110 = arith.addf %109, %106 : vector<8x8xf32>
      %c0_64 = arith.constant 0 : index
      %c16_65 = arith.constant 16 : index
      %111 = vector.load %arg10[%c0_64, %c16_65] : memref<8x32xf32, #tpu.memory_space<vmem>>, vector<8x8xf32>
      tpu.vector_store %arg10[%c0_64, %c16_65], %110 {strides = array<i32>} : memref<8x32xf32, #tpu.memory_space<vmem>>, vector<8x8xf32>,
      %c2_66 = arith.constant 2 : index
      %c0_67 = arith.constant 0 : index
      %c0_68 = arith.constant 0 : index
      %112 = vector.load %arg8[%c2_66, %c0_67, %c0_68] : memref<4x8x1xf32, #tpu.memory_space<vmem>>, vector<1x8x1xf32>
      %113 = vector.shape_cast %112 : vector<1x8x1xf32> to vector<8x1xf32>
      %114 = vector.shape_cast %91 : vector<8x1xf32> to vector<1x8x1xf32>
      tpu.vector_store %arg8[%c2_66, %c0_67, %c0_68], %114 {strides = array<i32>} : memref<4x8x1xf32, #tpu.memory_space<vmem>>, vector<1x8x1xf32>,
      %115 = vector.extract_strided_slice %14 {offsets = [0, 24], sizes = [8, 8], strides = [1, 1]} : vector<8x32xf32> to vector<8x8xf32>
      %116 = vector.extract_strided_slice %16 {offsets = [0, 24], sizes = [8, 8], strides = [1, 1]} : vector<8x32xf32> to vector<8x8xf32>
      %117 = vector.extract_strided_slice %18 {offsets = [0, 24], sizes = [8, 8], strides = [1, 1]} : vector<8x32xf32> to vector<8x8xf32>
      %cst_69 = arith.constant dense<0.000000e+00> : vector<8x8xf32>
      %118 = tpu.matmul %115, %116, %cst_69 {dimension_numbers = #tpu.dot_dimension_numbers<[1], [1], [0], [0], [0, 0, 1, 0], [], []>} : vector<8x8xf32>, vector<8x8xf32>, vector<8x8xf32> -> vector<8x8xf32>
      %c3 = arith.constant 3 : index
      %c0_70 = arith.constant 0 : index
      %c0_71 = arith.constant 0 : index
      %119 = vector.load %arg8[%c3, %c0_70, %c0_71] : memref<4x8x1xf32, #tpu.memory_space<vmem>>, vector<1x8x1xf32>
      %120 = vector.shape_cast %119 : vector<1x8x1xf32> to vector<8x1xf32>
      %cst_72 = arith.constant dense<0xFF800000> : vector<8xf32>
      %121 = vector.multi_reduction <maximumf>, %118, %cst_72 [1] : vector<8x8xf32> to vector<8xf32>
      %122 = vector.shape_cast %121 : vector<8xf32> to vector<8x1xf32>
      %123 = arith.maximumf %120, %122 : vector<8x1xf32>
      %124 = arith.subf %120, %123 : vector<8x1xf32>
      %125 = math.exp %124 : vector<8x1xf32>
      %126 = vector.broadcast %123 : vector<8x1xf32> to vector<8x8xf32>
      %127 = arith.subf %118, %126 : vector<8x8xf32>
      %128 = math.exp %127 : vector<8x8xf32>
      %c3_73 = arith.constant 3 : index
      %c0_74 = arith.constant 0 : index
      %c0_75 = arith.constant 0 : index
      %129 = vector.load %arg9[%c3_73, %c0_74, %c0_75] : memref<4x8x1xf32, #tpu.memory_space<vmem>>, vector<1x8x1xf32>
      %130 = vector.shape_cast %129 : vector<1x8x1xf32> to vector<8x1xf32>
      %131 = arith.mulf %125, %130 : vector<8x1xf32>
      %cst_76 = arith.constant dense<0.000000e+00> : vector<8xf32>
      %132 = vector.multi_reduction <add>, %128, %cst_76 [1] : vector<8x8xf32> to vector<8xf32>
      %133 = vector.shape_cast %132 : vector<8xf32> to vector<8x1xf32>
      %134 = arith.addf %131, %133 : vector<8x1xf32>
      %c3_77 = arith.constant 3 : index
      %c0_78 = arith.constant 0 : index
      %c0_79 = arith.constant 0 : index
      %135 = vector.load %arg9[%c3_77, %c0_78, %c0_79] : memref<4x8x1xf32, #tpu.memory_space<vmem>>, vector<1x8x1xf32>
      %136 = vector.shape_cast %135 : vector<1x8x1xf32> to vector<8x1xf32>
      %137 = vector.shape_cast %134 : vector<8x1xf32> to vector<1x8x1xf32>
      tpu.vector_store %arg9[%c3_77, %c0_78, %c0_79], %137 {strides = array<i32>} : memref<4x8x1xf32, #tpu.memory_space<vmem>>, vector<1x8x1xf32>,
      %cst_80 = arith.constant dense<0.000000e+00> : vector<8x8xf32>
      %138 = tpu.matmul %128, %117, %cst_80 {dimension_numbers = #tpu.dot_dimension_numbers<[1], [0], [0], [1], [0, 0, 1, 1], [], []>} : vector<8x8xf32>, vector<8x8xf32>, vector<8x8xf32> -> vector<8x8xf32>
      %c0_81 = arith.constant 0 : index
      %c24 = arith.constant 24 : index
      %139 = vector.load %arg10[%c0_81, %c24] : memref<8x32xf32, #tpu.memory_space<vmem>>, vector<8x8xf32>
      %140 = vector.broadcast %125 : vector<8x1xf32> to vector<8x8xf32>
      %141 = arith.mulf %140, %139 : vector<8x8xf32>
      %142 = arith.addf %141, %138 : vector<8x8xf32>
      %c0_82 = arith.constant 0 : index
      %c24_83 = arith.constant 24 : index
      %143 = vector.load %arg10[%c0_82, %c24_83] : memref<8x32xf32, #tpu.memory_space<vmem>>, vector<8x8xf32>
      tpu.vector_store %arg10[%c0_82, %c24_83], %142 {strides = array<i32>} : memref<8x32xf32, #tpu.memory_space<vmem>>, vector<8x8xf32>,
      %c3_84 = arith.constant 3 : index
      %c0_85 = arith.constant 0 : index
      %c0_86 = arith.constant 0 : index
      %144 = vector.load %arg8[%c3_84, %c0_85, %c0_86] : memref<4x8x1xf32, #tpu.memory_space<vmem>>, vector<1x8x1xf32>
      %145 = vector.shape_cast %144 : vector<1x8x1xf32> to vector<8x1xf32>
      %146 = vector.shape_cast %123 : vector<8x1xf32> to vector<1x8x1xf32>
      tpu.vector_store %arg8[%c3_84, %c0_85, %c0_86], %146 {strides = array<i32>} : memref<4x8x1xf32, #tpu.memory_space<vmem>>, vector<1x8x1xf32>,
    } else {
    }
    %10 = arith.cmpi eq, %3, %1 : i32
    %11 = arith.extui %10 : i1 to i32
    %c0_i32_2 = arith.constant 0 : i32
    %12 = arith.cmpi ne, %11, %c0_i32_2 : i32
    scf.if %12 {
      %c0 = arith.constant 0 : index
      %c0_3 = arith.constant 0 : index
      %c0_4 = arith.constant 0 : index
      %c0_5 = arith.constant 0 : index
      %13 = vector.load %arg4[%c0, %c0_3, %c0_4, %c0_5] : memref<1x1x8x32xf32, #tpu.memory_space<vmem>>, vector<1x1x8x32xf32>
      %14 = vector.shape_cast %13 : vector<1x1x8x32xf32> to vector<8x32xf32>
      %c0_6 = arith.constant 0 : index
      %c0_7 = arith.constant 0 : index
      %c0_8 = arith.constant 0 : index
      %c0_9 = arith.constant 0 : index
      %15 = vector.load %arg5[%c0_6, %c0_7, %c0_8, %c0_9] : memref<1x1x8x32xf32, #tpu.memory_space<vmem>>, vector<1x1x8x32xf32>
      %16 = vector.shape_cast %15 : vector<1x1x8x32xf32> to vector<8x32xf32>
      %c0_10 = arith.constant 0 : index
      %c0_11 = arith.constant 0 : index
      %c0_12 = arith.constant 0 : index
      %c0_13 = arith.constant 0 : index
      %17 = vector.load %arg6[%c0_10, %c0_11, %c0_12, %c0_13] : memref<1x1x8x32xf32, #tpu.memory_space<vmem>>, vector<1x1x8x32xf32>
      %18 = vector.shape_cast %17 : vector<1x1x8x32xf32> to vector<8x32xf32>
      %19 = tpu.iota {dimensions = array<i32: 0>} : vector<8x8xi32>
      %20 = tpu.iota {dimensions = array<i32: 1>} : vector<8x8xi32>
      %21 = arith.cmpi sge, %19, %20 : vector<8x8xi32>
      %22 = vector.extract_strided_slice %14 {offsets = [0, 0], sizes = [8, 8], strides = [1, 1]} : vector<8x32xf32> to vector<8x8xf32>
      %23 = vector.extract_strided_slice %16 {offsets = [0, 0], sizes = [8, 8], strides = [1, 1]} : vector<8x32xf32> to vector<8x8xf32>
      %24 = vector.extract_strided_slice %18 {offsets = [0, 0], sizes = [8, 8], strides = [1, 1]} : vector<8x32xf32> to vector<8x8xf32>
      %cst = arith.constant dense<0.000000e+00> : vector<8x8xf32>
      %25 = tpu.matmul %22, %23, %cst {dimension_numbers = #tpu.dot_dimension_numbers<[1], [1], [0], [0], [0, 0, 1, 0], [], []>} : vector<8x8xf32>, vector<8x8xf32>, vector<8x8xf32> -> vector<8x8xf32>
      %cst_14 = arith.constant -1.000000e+30 : f32
      %26 = vector.broadcast %cst_14 : f32 to vector<8x8xf32>
      %27 = arith.select %21, %25, %26 : vector<8x8xi1>, vector<8x8xf32>
      %c0_15 = arith.constant 0 : index
      %c0_16 = arith.constant 0 : index
      %c0_17 = arith.constant 0 : index
      %28 = vector.load %arg8[%c0_15, %c0_16, %c0_17] : memref<4x8x1xf32, #tpu.memory_space<vmem>>, vector<1x8x1xf32>
      %29 = vector.shape_cast %28 : vector<1x8x1xf32> to vector<8x1xf32>
      %cst_18 = arith.constant dense<0xFF800000> : vector<8xf32>
      %30 = vector.multi_reduction <maximumf>, %27, %cst_18 [1] : vector<8x8xf32> to vector<8xf32>
      %31 = vector.shape_cast %30 : vector<8xf32> to vector<8x1xf32>
      %32 = arith.maximumf %29, %31 : vector<8x1xf32>
      %33 = arith.subf %29, %32 : vector<8x1xf32>
      %34 = math.exp %33 : vector<8x1xf32>
      %35 = vector.broadcast %32 : vector<8x1xf32> to vector<8x8xf32>
      %36 = arith.subf %27, %35 : vector<8x8xf32>
      %37 = math.exp %36 : vector<8x8xf32>
      %c0_19 = arith.constant 0 : index
      %c0_20 = arith.constant 0 : index
      %c0_21 = arith.constant 0 : index
      %38 = vector.load %arg9[%c0_19, %c0_20, %c0_21] : memref<4x8x1xf32, #tpu.memory_space<vmem>>, vector<1x8x1xf32>
      %39 = vector.shape_cast %38 : vector<1x8x1xf32> to vector<8x1xf32>
      %40 = arith.mulf %34, %39 : vector<8x1xf32>
      %cst_22 = arith.constant dense<0.000000e+00> : vector<8xf32>
      %41 = vector.multi_reduction <add>, %37, %cst_22 [1] : vector<8x8xf32> to vector<8xf32>
      %42 = vector.shape_cast %41 : vector<8xf32> to vector<8x1xf32>
      %43 = arith.addf %40, %42 : vector<8x1xf32>
      %c0_23 = arith.constant 0 : index
      %c0_24 = arith.constant 0 : index
      %c0_25 = arith.constant 0 : index
      %44 = vector.load %arg9[%c0_23, %c0_24, %c0_25] : memref<4x8x1xf32, #tpu.memory_space<vmem>>, vector<1x8x1xf32>
      %45 = vector.shape_cast %44 : vector<1x8x1xf32> to vector<8x1xf32>
      %46 = vector.shape_cast %43 : vector<8x1xf32> to vector<1x8x1xf32>
      tpu.vector_store %arg9[%c0_23, %c0_24, %c0_25], %46 {strides = array<i32>} : memref<4x8x1xf32, #tpu.memory_space<vmem>>, vector<1x8x1xf32>,
      %cst_26 = arith.constant dense<0.000000e+00> : vector<8x8xf32>
      %47 = tpu.matmul %37, %24, %cst_26 {dimension_numbers = #tpu.dot_dimension_numbers<[1], [0], [0], [1], [0, 0, 1, 1], [], []>} : vector<8x8xf32>, vector<8x8xf32>, vector<8x8xf32> -> vector<8x8xf32>
      %c0_27 = arith.constant 0 : index
      %c0_28 = arith.constant 0 : index
      %48 = vector.load %arg10[%c0_27, %c0_28] : memref<8x32xf32, #tpu.memory_space<vmem>>, vector<8x8xf32>
      %49 = vector.broadcast %34 : vector<8x1xf32> to vector<8x8xf32>
      %50 = arith.mulf %49, %48 : vector<8x8xf32>
      %51 = arith.addf %50, %47 : vector<8x8xf32>
      %c0_29 = arith.constant 0 : index
      %c0_30 = arith.constant 0 : index
      %52 = vector.load %arg10[%c0_29, %c0_30] : memref<8x32xf32, #tpu.memory_space<vmem>>, vector<8x8xf32>
      tpu.vector_store %arg10[%c0_29, %c0_30], %51 {strides = array<i32>} : memref<8x32xf32, #tpu.memory_space<vmem>>, vector<8x8xf32>,
      %c0_31 = arith.constant 0 : index
      %c0_32 = arith.constant 0 : index
      %c0_33 = arith.constant 0 : index
      %53 = vector.load %arg8[%c0_31, %c0_32, %c0_33] : memref<4x8x1xf32, #tpu.memory_space<vmem>>, vector<1x8x1xf32>
      %54 = vector.shape_cast %53 : vector<1x8x1xf32> to vector<8x1xf32>
      %55 = vector.shape_cast %32 : vector<8x1xf32> to vector<1x8x1xf32>
      tpu.vector_store %arg8[%c0_31, %c0_32, %c0_33], %55 {strides = array<i32>} : memref<4x8x1xf32, #tpu.memory_space<vmem>>, vector<1x8x1xf32>,
      %56 = vector.extract_strided_slice %14 {offsets = [0, 8], sizes = [8, 8], strides = [1, 1]} : vector<8x32xf32> to vector<8x8xf32>
      %57 = vector.extract_strided_slice %16 {offsets = [0, 8], sizes = [8, 8], strides = [1, 1]} : vector<8x32xf32> to vector<8x8xf32>
      %58 = vector.extract_strided_slice %18 {offsets = [0, 8], sizes = [8, 8], strides = [1, 1]} : vector<8x32xf32> to vector<8x8xf32>
      %cst_34 = arith.constant dense<0.000000e+00> : vector<8x8xf32>
      %59 = tpu.matmul %56, %57, %cst_34 {dimension_numbers = #tpu.dot_dimension_numbers<[1], [1], [0], [0], [0, 0, 1, 0], [], []>} : vector<8x8xf32>, vector<8x8xf32>, vector<8x8xf32> -> vector<8x8xf32>
      %cst_35 = arith.constant -1.000000e+30 : f32
      %60 = vector.broadcast %cst_35 : f32 to vector<8x8xf32>
      %61 = arith.select %21, %59, %60 : vector<8x8xi1>, vector<8x8xf32>
      %c1 = arith.constant 1 : index
      %c0_36 = arith.constant 0 : index
      %c0_37 = arith.constant 0 : index
      %62 = vector.load %arg8[%c1, %c0_36, %c0_37] : memref<4x8x1xf32, #tpu.memory_space<vmem>>, vector<1x8x1xf32>
      %63 = vector.shape_cast %62 : vector<1x8x1xf32> to vector<8x1xf32>
      %cst_38 = arith.constant dense<0xFF800000> : vector<8xf32>
      %64 = vector.multi_reduction <maximumf>, %61, %cst_38 [1] : vector<8x8xf32> to vector<8xf32>
      %65 = vector.shape_cast %64 : vector<8xf32> to vector<8x1xf32>
      %66 = arith.maximumf %63, %65 : vector<8x1xf32>
      %67 = arith.subf %63, %66 : vector<8x1xf32>
      %68 = math.exp %67 : vector<8x1xf32>
      %69 = vector.broadcast %66 : vector<8x1xf32> to vector<8x8xf32>
      %70 = arith.subf %61, %69 : vector<8x8xf32>
      %71 = math.exp %70 : vector<8x8xf32>
      %c1_39 = arith.constant 1 : index
      %c0_40 = arith.constant 0 : index
      %c0_41 = arith.constant 0 : index
      %72 = vector.load %arg9[%c1_39, %c0_40, %c0_41] : memref<4x8x1xf32, #tpu.memory_space<vmem>>, vector<1x8x1xf32>
      %73 = vector.shape_cast %72 : vector<1x8x1xf32> to vector<8x1xf32>
      %74 = arith.mulf %68, %73 : vector<8x1xf32>
      %cst_42 = arith.constant dense<0.000000e+00> : vector<8xf32>
      %75 = vector.multi_reduction <add>, %71, %cst_42 [1] : vector<8x8xf32> to vector<8xf32>
      %76 = vector.shape_cast %75 : vector<8xf32> to vector<8x1xf32>
      %77 = arith.addf %74, %76 : vector<8x1xf32>
      %c1_43 = arith.constant 1 : index
      %c0_44 = arith.constant 0 : index
      %c0_45 = arith.constant 0 : index
      %78 = vector.load %arg9[%c1_43, %c0_44, %c0_45] : memref<4x8x1xf32, #tpu.memory_space<vmem>>, vector<1x8x1xf32>
      %79 = vector.shape_cast %78 : vector<1x8x1xf32> to vector<8x1xf32>
      %80 = vector.shape_cast %77 : vector<8x1xf32> to vector<1x8x1xf32>
      tpu.vector_store %arg9[%c1_43, %c0_44, %c0_45], %80 {strides = array<i32>} : memref<4x8x1xf32, #tpu.memory_space<vmem>>, vector<1x8x1xf32>,
      %cst_46 = arith.constant dense<0.000000e+00> : vector<8x8xf32>
      %81 = tpu.matmul %71, %58, %cst_46 {dimension_numbers = #tpu.dot_dimension_numbers<[1], [0], [0], [1], [0, 0, 1, 1], [], []>} : vector<8x8xf32>, vector<8x8xf32>, vector<8x8xf32> -> vector<8x8xf32>
      %c0_47 = arith.constant 0 : index
      %c8 = arith.constant 8 : index
      %82 = vector.load %arg10[%c0_47, %c8] : memref<8x32xf32, #tpu.memory_space<vmem>>, vector<8x8xf32>
      %83 = vector.broadcast %68 : vector<8x1xf32> to vector<8x8xf32>
      %84 = arith.mulf %83, %82 : vector<8x8xf32>
      %85 = arith.addf %84, %81 : vector<8x8xf32>
      %c0_48 = arith.constant 0 : index
      %c8_49 = arith.constant 8 : index
      %86 = vector.load %arg10[%c0_48, %c8_49] : memref<8x32xf32, #tpu.memory_space<vmem>>, vector<8x8xf32>
      tpu.vector_store %arg10[%c0_48, %c8_49], %85 {strides = array<i32>} : memref<8x32xf32, #tpu.memory_space<vmem>>, vector<8x8xf32>,
      %c1_50 = arith.constant 1 : index
      %c0_51 = arith.constant 0 : index
      %c0_52 = arith.constant 0 : index
      %87 = vector.load %arg8[%c1_50, %c0_51, %c0_52] : memref<4x8x1xf32, #tpu.memory_space<vmem>>, vector<1x8x1xf32>
      %88 = vector.shape_cast %87 : vector<1x8x1xf32> to vector<8x1xf32>
      %89 = vector.shape_cast %66 : vector<8x1xf32> to vector<1x8x1xf32>
      tpu.vector_store %arg8[%c1_50, %c0_51, %c0_52], %89 {strides = array<i32>} : memref<4x8x1xf32, #tpu.memory_space<vmem>>, vector<1x8x1xf32>,
      %90 = vector.extract_strided_slice %14 {offsets = [0, 16], sizes = [8, 8], strides = [1, 1]} : vector<8x32xf32> to vector<8x8xf32>
      %91 = vector.extract_strided_slice %16 {offsets = [0, 16], sizes = [8, 8], strides = [1, 1]} : vector<8x32xf32> to vector<8x8xf32>
      %92 = vector.extract_strided_slice %18 {offsets = [0, 16], sizes = [8, 8], strides = [1, 1]} : vector<8x32xf32> to vector<8x8xf32>
      %cst_53 = arith.constant dense<0.000000e+00> : vector<8x8xf32>
      %93 = tpu.matmul %90, %91, %cst_53 {dimension_numbers = #tpu.dot_dimension_numbers<[1], [1], [0], [0], [0, 0, 1, 0], [], []>} : vector<8x8xf32>, vector<8x8xf32>, vector<8x8xf32> -> vector<8x8xf32>
      %cst_54 = arith.constant -1.000000e+30 : f32
      %94 = vector.broadcast %cst_54 : f32 to vector<8x8xf32>
      %95 = arith.select %21, %93, %94 : vector<8x8xi1>, vector<8x8xf32>
      %c2 = arith.constant 2 : index
      %c0_55 = arith.constant 0 : index
      %c0_56 = arith.constant 0 : index
      %96 = vector.load %arg8[%c2, %c0_55, %c0_56] : memref<4x8x1xf32, #tpu.memory_space<vmem>>, vector<1x8x1xf32>
      %97 = vector.shape_cast %96 : vector<1x8x1xf32> to vector<8x1xf32>
      %cst_57 = arith.constant dense<0xFF800000> : vector<8xf32>
      %98 = vector.multi_reduction <maximumf>, %95, %cst_57 [1] : vector<8x8xf32> to vector<8xf32>
      %99 = vector.shape_cast %98 : vector<8xf32> to vector<8x1xf32>
      %100 = arith.maximumf %97, %99 : vector<8x1xf32>
      %101 = arith.subf %97, %100 : vector<8x1xf32>
      %102 = math.exp %101 : vector<8x1xf32>
      %103 = vector.broadcast %100 : vector<8x1xf32> to vector<8x8xf32>
      %104 = arith.subf %95, %103 : vector<8x8xf32>
      %105 = math.exp %104 : vector<8x8xf32>
      %c2_58 = arith.constant 2 : index
      %c0_59 = arith.constant 0 : index
      %c0_60 = arith.constant 0 : index
      %106 = vector.load %arg9[%c2_58, %c0_59, %c0_60] : memref<4x8x1xf32, #tpu.memory_space<vmem>>, vector<1x8x1xf32>
      %107 = vector.shape_cast %106 : vector<1x8x1xf32> to vector<8x1xf32>
      %108 = arith.mulf %102, %107 : vector<8x1xf32>
      %cst_61 = arith.constant dense<0.000000e+00> : vector<8xf32>
      %109 = vector.multi_reduction <add>, %105, %cst_61 [1] : vector<8x8xf32> to vector<8xf32>
      %110 = vector.shape_cast %109 : vector<8xf32> to vector<8x1xf32>
      %111 = arith.addf %108, %110 : vector<8x1xf32>
      %c2_62 = arith.constant 2 : index
      %c0_63 = arith.constant 0 : index
      %c0_64 = arith.constant 0 : index
      %112 = vector.load %arg9[%c2_62, %c0_63, %c0_64] : memref<4x8x1xf32, #tpu.memory_space<vmem>>, vector<1x8x1xf32>
      %113 = vector.shape_cast %112 : vector<1x8x1xf32> to vector<8x1xf32>
      %114 = vector.shape_cast %111 : vector<8x1xf32> to vector<1x8x1xf32>
      tpu.vector_store %arg9[%c2_62, %c0_63, %c0_64], %114 {strides = array<i32>} : memref<4x8x1xf32, #tpu.memory_space<vmem>>, vector<1x8x1xf32>,
      %cst_65 = arith.constant dense<0.000000e+00> : vector<8x8xf32>
      %115 = tpu.matmul %105, %92, %cst_65 {dimension_numbers = #tpu.dot_dimension_numbers<[1], [0], [0], [1], [0, 0, 1, 1], [], []>} : vector<8x8xf32>, vector<8x8xf32>, vector<8x8xf32> -> vector<8x8xf32>
      %c0_66 = arith.constant 0 : index
      %c16 = arith.constant 16 : index
      %116 = vector.load %arg10[%c0_66, %c16] : memref<8x32xf32, #tpu.memory_space<vmem>>, vector<8x8xf32>
      %117 = vector.broadcast %102 : vector<8x1xf32> to vector<8x8xf32>
      %118 = arith.mulf %117, %116 : vector<8x8xf32>
      %119 = arith.addf %118, %115 : vector<8x8xf32>
      %c0_67 = arith.constant 0 : index
      %c16_68 = arith.constant 16 : index
      %120 = vector.load %arg10[%c0_67, %c16_68] : memref<8x32xf32, #tpu.memory_space<vmem>>, vector<8x8xf32>
      tpu.vector_store %arg10[%c0_67, %c16_68], %119 {strides = array<i32>} : memref<8x32xf32, #tpu.memory_space<vmem>>, vector<8x8xf32>,
      %c2_69 = arith.constant 2 : index
      %c0_70 = arith.constant 0 : index
      %c0_71 = arith.constant 0 : index
      %121 = vector.load %arg8[%c2_69, %c0_70, %c0_71] : memref<4x8x1xf32, #tpu.memory_space<vmem>>, vector<1x8x1xf32>
      %122 = vector.shape_cast %121 : vector<1x8x1xf32> to vector<8x1xf32>
      %123 = vector.shape_cast %100 : vector<8x1xf32> to vector<1x8x1xf32>
      tpu.vector_store %arg8[%c2_69, %c0_70, %c0_71], %123 {strides = array<i32>} : memref<4x8x1xf32, #tpu.memory_space<vmem>>, vector<1x8x1xf32>,
      %124 = vector.extract_strided_slice %14 {offsets = [0, 24], sizes = [8, 8], strides = [1, 1]} : vector<8x32xf32> to vector<8x8xf32>
      %125 = vector.extract_strided_slice %16 {offsets = [0, 24], sizes = [8, 8], strides = [1, 1]} : vector<8x32xf32> to vector<8x8xf32>
      %126 = vector.extract_strided_slice %18 {offsets = [0, 24], sizes = [8, 8], strides = [1, 1]} : vector<8x32xf32> to vector<8x8xf32>
      %cst_72 = arith.constant dense<0.000000e+00> : vector<8x8xf32>
      %127 = tpu.matmul %124, %125, %cst_72 {dimension_numbers = #tpu.dot_dimension_numbers<[1], [1], [0], [0], [0, 0, 1, 0], [], []>} : vector<8x8xf32>, vector<8x8xf32>, vector<8x8xf32> -> vector<8x8xf32>
      %cst_73 = arith.constant -1.000000e+30 : f32
      %128 = vector.broadcast %cst_73 : f32 to vector<8x8xf32>
      %129 = arith.select %21, %127, %128 : vector<8x8xi1>, vector<8x8xf32>
      %c3 = arith.constant 3 : index
      %c0_74 = arith.constant 0 : index
      %c0_75 = arith.constant 0 : index
      %130 = vector.load %arg8[%c3, %c0_74, %c0_75] : memref<4x8x1xf32, #tpu.memory_space<vmem>>, vector<1x8x1xf32>
      %131 = vector.shape_cast %130 : vector<1x8x1xf32> to vector<8x1xf32>
      %cst_76 = arith.constant dense<0xFF800000> : vector<8xf32>
      %132 = vector.multi_reduction <maximumf>, %129, %cst_76 [1] : vector<8x8xf32> to vector<8xf32>
      %133 = vector.shape_cast %132 : vector<8xf32> to vector<8x1xf32>
      %134 = arith.maximumf %131, %133 : vector<8x1xf32>
      %135 = arith.subf %131, %134 : vector<8x1xf32>
      %136 = math.exp %135 : vector<8x1xf32>
      %137 = vector.broadcast %134 : vector<8x1xf32> to vector<8x8xf32>
      %138 = arith.subf %129, %137 : vector<8x8xf32>
      %139 = math.exp %138 : vector<8x8xf32>
      %c3_77 = arith.constant 3 : index
      %c0_78 = arith.constant 0 : index
      %c0_79 = arith.constant 0 : index
      %140 = vector.load %arg9[%c3_77, %c0_78, %c0_79] : memref<4x8x1xf32, #tpu.memory_space<vmem>>, vector<1x8x1xf32>
      %141 = vector.shape_cast %140 : vector<1x8x1xf32> to vector<8x1xf32>
      %142 = arith.mulf %136, %141 : vector<8x1xf32>
      %cst_80 = arith.constant dense<0.000000e+00> : vector<8xf32>
      %143 = vector.multi_reduction <add>, %139, %cst_80 [1] : vector<8x8xf32> to vector<8xf32>
      %144 = vector.shape_cast %143 : vector<8xf32> to vector<8x1xf32>
      %145 = arith.addf %142, %144 : vector<8x1xf32>
      %c3_81 = arith.constant 3 : index
      %c0_82 = arith.constant 0 : index
      %c0_83 = arith.constant 0 : index
      %146 = vector.load %arg9[%c3_81, %c0_82, %c0_83] : memref<4x8x1xf32, #tpu.memory_space<vmem>>, vector<1x8x1xf32>
      %147 = vector.shape_cast %146 : vector<1x8x1xf32> to vector<8x1xf32>
      %148 = vector.shape_cast %145 : vector<8x1xf32> to vector<1x8x1xf32>
      tpu.vector_store %arg9[%c3_81, %c0_82, %c0_83], %148 {strides = array<i32>} : memref<4x8x1xf32, #tpu.memory_space<vmem>>, vector<1x8x1xf32>,
      %cst_84 = arith.constant dense<0.000000e+00> : vector<8x8xf32>
      %149 = tpu.matmul %139, %126, %cst_84 {dimension_numbers = #tpu.dot_dimension_numbers<[1], [0], [0], [1], [0, 0, 1, 1], [], []>} : vector<8x8xf32>, vector<8x8xf32>, vector<8x8xf32> -> vector<8x8xf32>
      %c0_85 = arith.constant 0 : index
      %c24 = arith.constant 24 : index
      %150 = vector.load %arg10[%c0_85, %c24] : memref<8x32xf32, #tpu.memory_space<vmem>>, vector<8x8xf32>
      %151 = vector.broadcast %136 : vector<8x1xf32> to vector<8x8xf32>
      %152 = arith.mulf %151, %150 : vector<8x8xf32>
      %153 = arith.addf %152, %149 : vector<8x8xf32>
      %c0_86 = arith.constant 0 : index
      %c24_87 = arith.constant 24 : index
      %154 = vector.load %arg10[%c0_86, %c24_87] : memref<8x32xf32, #tpu.memory_space<vmem>>, vector<8x8xf32>
      tpu.vector_store %arg10[%c0_86, %c24_87], %153 {strides = array<i32>} : memref<8x32xf32, #tpu.memory_space<vmem>>, vector<8x8xf32>,
      %c3_88 = arith.constant 3 : index
      %c0_89 = arith.constant 0 : index
      %c0_90 = arith.constant 0 : index
      %155 = vector.load %arg8[%c3_88, %c0_89, %c0_90] : memref<4x8x1xf32, #tpu.memory_space<vmem>>, vector<1x8x1xf32>
      %156 = vector.shape_cast %155 : vector<1x8x1xf32> to vector<8x1xf32>
      %157 = vector.shape_cast %134 : vector<8x1xf32> to vector<1x8x1xf32>
      tpu.vector_store %arg8[%c3_88, %c0_89, %c0_90], %157 {strides = array<i32>} : memref<4x8x1xf32, #tpu.memory_space<vmem>>, vector<1x8x1xf32>,
      %c0_91 = arith.constant 0 : index
      %c0_92 = arith.constant 0 : index
      %c0_93 = arith.constant 0 : index
      %158 = vector.load %arg9[%c0_91, %c0_92, %c0_93] : memref<4x8x1xf32, #tpu.memory_space<vmem>>, vector<1x8x1xf32>
      %159 = vector.shape_cast %158 : vector<1x8x1xf32> to vector<8x1xf32>
      %160 = tpu.reciprocal %159 {approx = true} : vector<8x1xf32> -> vector<8x1xf32>
      %161 = arith.mulf %159, %160 : vector<8x1xf32>
      %cst_94 = arith.constant 2.000000e+00 : f32
      %162 = vector.broadcast %cst_94 : f32 to vector<8x1xf32>
      %163 = arith.subf %162, %161 : vector<8x1xf32>
      %164 = arith.mulf %160, %163 : vector<8x1xf32>
      %c0_95 = arith.constant 0 : index
      %c0_96 = arith.constant 0 : index
      %165 = vector.load %arg10[%c0_95, %c0_96] : memref<8x32xf32, #tpu.memory_space<vmem>>, vector<8x8xf32>
      %166 = vector.broadcast %164 : vector<8x1xf32> to vector<8x8xf32>
      %167 = arith.mulf %165, %166 : vector<8x8xf32>
      %c0_97 = arith.constant 0 : index
      %c0_98 = arith.constant 0 : index
      %c0_99 = arith.constant 0 : index
      %168 = vector.load %arg7[%c0_97, %c0_98, %c0_99] : memref<1x8x32xf32, #tpu.memory_space<vmem>>, vector<1x8x8xf32>
      %169 = vector.shape_cast %168 : vector<1x8x8xf32> to vector<8x8xf32>
      %170 = vector.shape_cast %167 : vector<8x8xf32> to vector<1x8x8xf32>
      tpu.vector_store %arg7[%c0_97, %c0_98, %c0_99], %170 {strides = array<i32>} : memref<1x8x32xf32, #tpu.memory_space<vmem>>, vector<1x8x8xf32>,
      %c1_100 = arith.constant 1 : index
      %c0_101 = arith.constant 0 : index
      %c0_102 = arith.constant 0 : index
      %171 = vector.load %arg9[%c1_100, %c0_101, %c0_102] : memref<4x8x1xf32, #tpu.memory_space<vmem>>, vector<1x8x1xf32>
      %172 = vector.shape_cast %171 : vector<1x8x1xf32> to vector<8x1xf32>
      %173 = tpu.reciprocal %172 {approx = true} : vector<8x1xf32> -> vector<8x1xf32>
      %174 = arith.mulf %172, %173 : vector<8x1xf32>
      %cst_103 = arith.constant 2.000000e+00 : f32
      %175 = vector.broadcast %cst_103 : f32 to vector<8x1xf32>
      %176 = arith.subf %175, %174 : vector<8x1xf32>
      %177 = arith.mulf %173, %176 : vector<8x1xf32>
      %c0_104 = arith.constant 0 : index
      %c8_105 = arith.constant 8 : index
      %178 = vector.load %arg10[%c0_104, %c8_105] : memref<8x32xf32, #tpu.memory_space<vmem>>, vector<8x8xf32>
      %179 = vector.broadcast %177 : vector<8x1xf32> to vector<8x8xf32>
      %180 = arith.mulf %178, %179 : vector<8x8xf32>
      %c0_106 = arith.constant 0 : index
      %c0_107 = arith.constant 0 : index
      %c8_108 = arith.constant 8 : index
      %181 = vector.load %arg7[%c0_106, %c0_107, %c8_108] : memref<1x8x32xf32, #tpu.memory_space<vmem>>, vector<1x8x8xf32>
      %182 = vector.shape_cast %181 : vector<1x8x8xf32> to vector<8x8xf32>
      %183 = vector.shape_cast %180 : vector<8x8xf32> to vector<1x8x8xf32>
      tpu.vector_store %arg7[%c0_106, %c0_107, %c8_108], %183 {strides = array<i32>} : memref<1x8x32xf32, #tpu.memory_space<vmem>>, vector<1x8x8xf32>,
      %c2_109 = arith.constant 2 : index
      %c0_110 = arith.constant 0 : index
      %c0_111 = arith.constant 0 : index
      %184 = vector.load %arg9[%c2_109, %c0_110, %c0_111] : memref<4x8x1xf32, #tpu.memory_space<vmem>>, vector<1x8x1xf32>
      %185 = vector.shape_cast %184 : vector<1x8x1xf32> to vector<8x1xf32>
      %186 = tpu.reciprocal %185 {approx = true} : vector<8x1xf32> -> vector<8x1xf32>
      %187 = arith.mulf %185, %186 : vector<8x1xf32>
      %cst_112 = arith.constant 2.000000e+00 : f32
      %188 = vector.broadcast %cst_112 : f32 to vector<8x1xf32>
      %189 = arith.subf %188, %187 : vector<8x1xf32>
      %190 = arith.mulf %186, %189 : vector<8x1xf32>
      %c0_113 = arith.constant 0 : index
      %c16_114 = arith.constant 16 : index
      %191 = vector.load %arg10[%c0_113, %c16_114] : memref<8x32xf32, #tpu.memory_space<vmem>>, vector<8x8xf32>
      %192 = vector.broadcast %190 : vector<8x1xf32> to vector<8x8xf32>
      %193 = arith.mulf %191, %192 : vector<8x8xf32>
      %c0_115 = arith.constant 0 : index
      %c0_116 = arith.constant 0 : index
      %c16_117 = arith.constant 16 : index
      %194 = vector.load %arg7[%c0_115, %c0_116, %c16_117] : memref<1x8x32xf32, #tpu.memory_space<vmem>>, vector<1x8x8xf32>
      %195 = vector.shape_cast %194 : vector<1x8x8xf32> to vector<8x8xf32>
      %196 = vector.shape_cast %193 : vector<8x8xf32> to vector<1x8x8xf32>
      tpu.vector_store %arg7[%c0_115, %c0_116, %c16_117], %196 {strides = array<i32>} : memref<1x8x32xf32, #tpu.memory_space<vmem>>, vector<1x8x8xf32>,
      %c3_118 = arith.constant 3 : index
      %c0_119 = arith.constant 0 : index
      %c0_120 = arith.constant 0 : index
      %197 = vector.load %arg9[%c3_118, %c0_119, %c0_120] : memref<4x8x1xf32, #tpu.memory_space<vmem>>, vector<1x8x1xf32>
      %198 = vector.shape_cast %197 : vector<1x8x1xf32> to vector<8x1xf32>
      %199 = tpu.reciprocal %198 {approx = true} : vector<8x1xf32> -> vector<8x1xf32>
      %200 = arith.mulf %198, %199 : vector<8x1xf32>
      %cst_121 = arith.constant 2.000000e+00 : f32
      %201 = vector.broadcast %cst_121 : f32 to vector<8x1xf32>
      %202 = arith.subf %201, %200 : vector<8x1xf32>
      %203 = arith.mulf %199, %202 : vector<8x1xf32>
      %c0_122 = arith.constant 0 : index
      %c24_123 = arith.constant 24 : index
      %204 = vector.load %arg10[%c0_122, %c24_123] : memref<8x32xf32, #tpu.memory_space<vmem>>, vector<8x8xf32>
      %205 = vector.broadcast %203 : vector<8x1xf32> to vector<8x8xf32>
      %206 = arith.mulf %204, %205 : vector<8x8xf32>
      %c0_124 = arith.constant 0 : index
      %c0_125 = arith.constant 0 : index
      %c24_126 = arith.constant 24 : index
      %207 = vector.load %arg7[%c0_124, %c0_125, %c24_126] : memref<1x8x32xf32, #tpu.memory_space<vmem>>, vector<1x8x8xf32>
      %208 = vector.shape_cast %207 : vector<1x8x8xf32> to vector<8x8xf32>
      %209 = vector.shape_cast %206 : vector<8x8xf32> to vector<1x8x8xf32>
      tpu.vector_store %arg7[%c0_124, %c0_125, %c24_126], %209 {strides = array<i32>} : memref<1x8x32xf32, #tpu.memory_space<vmem>>, vector<1x8x8xf32>,
    } else {
    }
    return
  }
  func.func @transform_0(%arg0: i32, %arg1: i32, %arg2: memref<1xi32, #tpu.memory_space<smem>>, %arg3: memref<1xi32, #tpu.memory_space<smem>>) -> (i32, i32, i32, i32) {
    %0 = arith.index_cast %arg1 : i32 to index
    %1 = memref.load %arg2[%0] : memref<1xi32, #tpu.memory_space<smem>>
    %c0_i32 = arith.constant 0 : i32
    %c0_i32_0 = arith.constant 0 : i32
    %c0_i32_1 = arith.constant 0 : i32
    return %c0_i32, %arg0, %1, %c0_i32_0 : i32, i32, i32, i32
  }
  func.func @transform_1(%arg0: i32, %arg1: i32, %arg2: memref<1xi32, #tpu.memory_space<smem>>, %arg3: memref<1xi32, #tpu.memory_space<smem>>) -> (i32, i32, i32, i32) {
    %0 = arith.index_cast %arg1 : i32 to index
    %1 = memref.load %arg3[%0] : memref<1xi32, #tpu.memory_space<smem>>
    %c1_i32 = arith.constant 1 : i32
    %c0_i32 = arith.constant 0 : i32
    %c0_i32_0 = arith.constant 0 : i32
    return %c1_i32, %arg0, %1, %c0_i32 : i32, i32, i32, i32
  }
  func.func @transform_2(%arg0: i32, %arg1: i32, %arg2: memref<1xi32, #tpu.memory_space<smem>>, %arg3: memref<1xi32, #tpu.memory_space<smem>>) -> (i32, i32, i32, i32) {
    %0 = arith.index_cast %arg1 : i32 to index
    %1 = memref.load %arg3[%0] : memref<1xi32, #tpu.memory_space<smem>>
    %c2_i32 = arith.constant 2 : i32
    %c0_i32 = arith.constant 0 : i32
    %c0_i32_0 = arith.constant 0 : i32
    return %c2_i32, %arg0, %1, %c0_i32 : i32, i32, i32, i32
  }
  func.func @transform_3(%arg0: i32, %arg1: i32, %arg2: memref<1xi32, #tpu.memory_space<smem>>, %arg3: memref<1xi32, #tpu.memory_space<smem>>) -> (i32, i32, i32) {
    %0 = arith.index_cast %arg1 : i32 to index
    %1 = memref.load %arg2[%0] : memref<1xi32, #tpu.memory_space<smem>>
    %c0_i32 = arith.constant 0 : i32
    %c0_i32_0 = arith.constant 0 : i32
    return %arg0, %1, %c0_i32 : i32, i32, i32
  }
}

</mosaic_0001>

<bundles_post_ra>
// kernel: multihead_attention.5
= control target key start
LH: loop header
LB: loop body
LE: loop exit
PB: predicated region body
PF: predicated region fallthrough
CT: control target
= control target key end

     0   :  { %vm19_vm0 = vcmask 261120   ;;  %v204_v6 = vmov 0.0   ;;  %s269_s0 = inlined_call_operand.vmem [shape: f32[16,32], index: 0, kind: input, shape index: {}]   ;;  %s270_s1 = inlined_call_operand.vmem [shape: f32[1,32,32], index: 1, kind: input, shape index: {}]   ;;  %s271_s2 = inlined_call_operand.vmem [shape: f32[1,1,32], index: 2, kind: input, shape index: {}]   ;;  %s272_s3 = inlined_call_operand.hbm [shape: f32[1,16,32], index: 3, kind: output, shape index: {}]  }
   0x1   :  { %v24_v0 = vld [vmem:[%s270_s1] sm:$0xff]  ;;  %v25_v1 = vld [vmem:[%s270_s1 + $0x8] sm:$0xff]  ;;  %v26_v2 = vld [vmem:[%s270_s1 + $0x10] sm:$0xff]  ;;  %21 = vst.msk [vmem:[#allocation2 + $0x8] sm:$0xff] %vm19_vm0, %v204_v6 }
   0x2   :  { %v168_v3 = vpack.c.bf16 %v25_v1, %v24_v0  ;;  %v27_v4 = vld [vmem:[%s270_s1 + $0x18] sm:$0xff]  ;;  %v22_v5 = vld [vmem:[%s269_s0] sm:$0xff]  ;;  %20 = vst.msk [vmem:[#allocation2] sm:$0xff] %vm19_vm0, %v204_v6 }
   0x3   :  { %v172_v7 = vpack.c.bf16 %v27_v4, %v26_v2  ;;  %165 = vmatprep.mubr.msk.f32.mxu0 %vm19_vm0, %v22_v5 }
   0x4   :  { %8 = vsyncpa [#allocation4], 0  ;;  %169 = vmatprep.subr.bf16.mxu0 %v168_v3  ;;  %v23_v8 = vld [vmem:[%s269_s0 + $0x8] sm:$0xff]  ;;  %v150_v15 = vld [vmem:[%s271_s2] ss:$0 sm:$0xff]  ;;  %s205_s25 = smov [#allocation3]  }
   0x5   :  { %171 = vmatpush3.bf16.msra.mxu0 %v168_v3  ;;  %s137_s26 = sshll.u32 %s205_s25, 4  ;;  %s138_s26 = int_to_ptr.vmem [resolvable:$true] %s137_s26 }
   0x6   :  { %173 = vmatprep.subr.bf16.mxu0 %v172_v7  ;;  %s180_s0 = scalar_lea.vmem %s138_s26, 256  ;;  %p185_p1 = scmp.lt.s32.totalorder %s138_s26, %s138_s26 }
   0x7   :  { %p181_p0 = scmp.ne.s32.totalorder %s138_s26, %s180_s0  ;;  %p186_p2 = scmp.lt.s32.totalorder %s180_s0, %s180_s0 }
   0x8   :  { %v29_v9 = vld [vmem:[#allocation2 + $0x8] sm:$0xff] }
   0x9   :  { %175 = vmatpush3.bf16.msra.mxu0 %v172_v7  ;;  %v28_v10 = vld [vmem:[#allocation2] sm:$0xff]  ;;  %p187_p3 = por %p186_p2, %p185_p1 }
   0xb   :  { %p188_p4 = pnand %p187_p3, %p181_p0 }
   0xc   :  { %166 = vmatmul.mubr.msk.f32.vlgmr.msra.gmra.mrb[0].mxu0 %vm19_vm0, %v23_v8 }
  0xdf   :  { %v167_v11 = vpop.f32.mrb[0].mxu0 }
  0xe0   :  { %v113_v12 = vadd.f32 %v167_v11, %v29_v9  ;;  %v103_v13 = vpop.f32.mrb[1].mxu0 }
  0xe1   :  { %v112_v14 = vadd.f32 %v103_v13, %v28_v10 }
  0xe2   :  { %115 = vst.msk [vmem:[#allocation2 + $0x8] sm:$0xff] %vm19_vm0, %v113_v12 }
  0xe3   :  { %114 = vst.msk [vmem:[#allocation2] sm:$0xff] %vm19_vm0, %v112_v14 }
  0xe9   :  { %v120_v16 = vld [vmem:[#allocation2 + $0x8] sm:$0xff] }
  0xea   :  { %v119_v17 = vld [vmem:[#allocation2] sm:$0xff]  ;;  %v129_v18 = vadd.f32 %v150_v15, %v120_v16 }
  0xeb   :  { %v128_v19 = vadd.f32 %v150_v15, %v119_v17 }
  0xec   :  { %131 = vst.msk [vmem:[#allocation3 + $0x8] sm:$0xff] %vm19_vm0, %v129_v18 }
  0xed   :  { %130 = vst.msk [vmem:[#allocation3] sm:$0xff] %vm19_vm0, %v128_v19 }
  0xee   :  { %191 = shalt.err (!%p188_p4)
}
  0xef   :  { %s192_s28 = scalar_lea.hbm %s272_s3, 256 }
  0xf0   :  { %p193_p5 = scmp.ne.s32.totalorder %s272_s3, %s192_s28  ;;  %p196_p6 = scmp.lt.u32.totalorder %s192_s28, %s272_s3 }
  0xf2   :  { %p198_p7 = pnand %p196_p6, %p193_p5 }
  0xf4   :  { %201 = shalt.err (!%p198_p7)
}
  0xf5   :  { %s206_s6 = smov 128   ;;  %s207_s7 = smov 8  }
  0xf6   :  { %143 = dma.vmem_to_hbm [thread:$0]  %s138_s26, 256, %s272_s3, [#allocation4], %s206_s6, %s206_s6, %s207_s7  }
  0xf7   :  { %202 = dma.done.wait [#allocation4], 256  }
  0xf8   :  { %203 = vsyncadd [#allocation4], 4294967040 }
  0xf9   :  { %147 = vsyncpa [#allocation4], 1 }

// kernel: multihead_attention.3
= control target key start
LH: loop header
LB: loop body
LE: loop exit
PB: predicated region body
PF: predicated region fallthrough
CT: control target
= control target key end

     0   :  { %8 = vsyncpa [#allocation4], 0  ;;  %s981_s0 = inlined_call_operand.hbm [shape: f32[16,32], index: 0, kind: input, shape index: {}]   ;;  %s982_s1 = inlined_call_operand.hbm [shape: f32[3,32,32], index: 1, kind: input, shape index: {}]   ;;  %s983_s2 = inlined_call_operand.vmem [shape: f32[3,1,32], index: 2, kind: input, shape index: {}]   ;;  %s984_s3 = inlined_call_operand.vmem [shape: f32[3,16,32], index: 3, kind: output, shape index: {}]  }
   0x1   :  { %9 = vsyncpa [#allocation6], 0 }
   0x2   :  { %11 = vsyncpa [#allocation6 + $0x1], 0  ;;  %s806_s12 = smov 0   ;;  %s808_s13 = smov 0  }
   0x3   :  { %s810_s14 = smov 0   ;;  %s812_s15 = smov 0  }
   0x4   :  { %s814_s16 = smov 0   ;;  %s816_s17 = smov 0  }
   0x5 LB: > { %s553_s18 = sadd.s32 4294967295, %s779_s17   ;;  %p95_p0 = scmp.ne.s32.totalorder %s763_s13, %s759_s12  ;;  %s779_s17 = sphi %s816_s17, %s17_s17   ;;  %s775_s16 = sphi %s814_s16, %s1001_s16   ;;  %s771_s15 = sphi %s812_s15, %s1000_s15   ;;  %s767_s14 = sphi %s810_s14, %s999_s14   ;;  %s763_s13 = sphi %s808_s13, %s998_s13   ;;  %s759_s12 = sphi %s806_s12, %s997_s12  }
   0x6   : > { %p836_p1 = scmp.eq.s32.totalorder %s553_s18, 0  ;;  %p555_p2 = scmp.ge.s32.totalorder %s779_s17, 1 }
   0x7   : > { %p164_p3 = scmp.lt.s32.totalorder %s779_s17, 4  ;;  %s781_s22 = smov [#allocation3]  }
   0x8   : > { %s989_s19 = scalar_select %p836_p1, 1, 0 }
   0x9   : > { %p844_p4 = por %p836_p1, %p95_p0  ;;  %p848_p5 = pnand %p555_p2, %p164_p3 }
   0xa   : > { %s180_s23 = sshll.u32 %s781_s22, 4  ;;  %s43_s25 = sadd.s32 1, %s775_s16  ;;  %s181_s23 = int_to_ptr.vmem [resolvable:$true] %s180_s23 }
   0xb   : > { %s990_s20 = scalar_select %p844_p4, 1, 0 }
   0xc   : > { %s991_s21 = scalar_select %p848_p5, 1, 0 }
   0xd   : > { %p604_p6 = pneg %p848_p5  ;;  %s667_s28 = scalar_lea.hbm %s981_s0, 256 }
   0xe   : > { %p668_p8 = scmp.ne.s32.totalorder %s981_s0, %s667_s28  ;;  %p674_p12 = scmp.lt.u32.totalorder %s667_s28, %s981_s0 }
   0xf   : > { %p856_p7 = pnand %p604_p6, %p836_p1 }
  0x11   : > { %p669_p9 = pneg %p856_p7 }
  0x13   : > { %p670_p10 = pnand %p669_p9, %p668_p8 }
  0x15   : > { %p671_p11 = pneg %p670_p10 }
  0x17   : > { %p676_p13 = pnand %p674_p12, %p671_p11 }
  0x19   : > { %679 = shalt.err (!%p676_p13)
}
  0x1a   : > { %s680_s6 = scalar_lea.vmem %s181_s23, 256  ;;  %p688_p6 = scmp.lt.s32.totalorder %s181_s23, %s181_s23 }
  0x1b   : > { %p681_p0 = scmp.ne.s32.totalorder %s181_s23, %s680_s6  ;;  %p689_p4 = scmp.lt.s32.totalorder %s680_s6, %s680_s6 }
  0x1d   : > { %p683_p2 = pnand %p681_p0, %p669_p9  ;;  %p690_p1 = por %p689_p4, %p688_p6 }
  0x1f   : > { %p684_p3 = pneg %p683_p2 }
  0x21   : > { %p691_p5 = pnand %p690_p1, %p684_p3 }
  0x23   : > { %694 = shalt.err (!%p691_p5)
}
  0x24   : > { %s782_s7 = smov 128   ;;  %s783_s8 = smov 8  }
  0x25   : > { %607 = dma.hbm_to_vmem [thread:$0]  (!%p856_p7), %s981_s0, 256, %s181_s23, [#allocation4], %s782_s7, %s782_s7, %s783_s8  }
  0x26   : > { %p45_p1 = scmp.ge.s32.totalorder %s43_s25, 3  ;;  %s82_s11 = sadd.s32 1, %s767_s14 }
  0x27   : > { %p89_p4 = scmp.ne.s32.totalorder %s767_s14, %s763_s13  ;;  %p90_p5 = scmp.eq.s32.totalorder %s779_s17, 0 }
  0x28   : > { %s1003_s25 = smov (%p45_p1, %s43_s25), 0  ;;  %p613_p9 = scmp.lt.s32.totalorder %s779_s17, 3 }
  0x29   : > { %p91_p8 = por %p90_p5, %p89_p4  ;;  %s75_s12 = ssub.s32 %s775_s16, %s1003_s25 }
  0x2a   : > { %s194_s18 = sand.u32 1, %s767_s14   ;;  %p80_p10 = scmp.eq.s32.totalorder %s75_s12, 0 }
  0x2b   : > { %s558_s22 = sshll.u32 %s194_s18, 5  ;;  %s571_s24 = sshll.u32 %s775_s16, 9 }
  0x2c   : > { %s892_s26 = scalar_select %p80_p10, %s767_s14, %s82_s11  }
  0x2d   : > { %s897_s23 = scalar_lea.hbm %s982_s1, %s571_s24  ;;  %s198_s29 = scalar_lea.vmem [#allocation5], %s558_s22 }
  0x2e   : > { %s208_s30 = sshll.u32 %s198_s29, 4  ;;  %p899_p7 = pnand %p613_p9, %p91_p8  ;;  %s903_s30 = int_to_ptr.vmem [resolvable:$true] %s208_s30 }
  0x2f   : > { %s905_s5 = scalar_lea.sflag [#allocation6], %s194_s18  ;;  %s695_s6 = scalar_lea.hbm %s897_s23, 512 }
  0x30   : > { %p696_p11 = scmp.ne.s32.totalorder %s897_s23, %s695_s6  ;;  %p697_p12 = pneg %p899_p7 }
  0x31   : > { %s700_s11 = scalar_lea.hbm %s982_s1, 1536  ;;  %p701_p2 = scmp.lt.u32.totalorder %s897_s23, %s982_s1 }
  0x32   : > { %p698_p13 = pnand %p697_p12, %p696_p11  ;;  %p702_p3 = scmp.lt.u32.totalorder %s700_s11, %s695_s6 }
  0x33   : > { %p704_p1 = scmp.lt.u32.totalorder %s695_s6, %s897_s23 }
  0x34   : > { %p699_p0 = pneg %p698_p13  ;;  %p703_p6 = por %p702_p3, %p701_p2 }
  0x36   : > { %p705_p4 = por %p704_p1, %p703_p6 }
  0x38   : > { %p706_p5 = pnand %p705_p4, %p699_p0 }
  0x3a   : > { %709 = shalt.err (!%p706_p5)
}
  0x3b   : > { %s710_s18 = scalar_lea.vmem %s903_s30, 512  ;;  %s784_s24 = smov [#allocation5]  }
  0x3c   : > { %p711_p8 = scmp.ne.s32.totalorder %s903_s30, %s710_s18  ;;  %s715_s27 = sshll.u32 %s784_s24, 4  ;;  %s716_s27 = int_to_ptr.vmem [resolvable:$false] %s715_s27 }
  0x3d   : > { %s717_s28 = scalar_lea.vmem %s716_s27, 1024  ;;  %p718_p11 = scmp.lt.s32.totalorder %s903_s30, %s716_s27 }
  0x3e   : > { %p713_p9 = pnand %p711_p8, %p697_p12  ;;  %p719_p13 = scmp.lt.s32.totalorder %s717_s28, %s710_s18 }
  0x40   : > { %p714_p10 = pneg %p713_p9  ;;  %p720_p2 = por %p719_p13, %p718_p11 }
  0x42   : > { %p721_p3 = pnand %p720_p2, %p714_p10 }
  0x44   : > { %724 = shalt.err (!%p721_p3)
}
  0x45   : > { %611 = dma.hbm_to_vmem [thread:$0]  (!%p899_p7), %s897_s23, 512, %s903_s30, %s905_s5, %s782_s7, %s782_s7, %s783_s8  }
  0x46   : > { %p994_p12 = scmp.ne.s32.totalorder %s991_s21, 0 }
  0x47   : > { %p995_p0 = scmp.ne.s32.totalorder (!%p994_p12), %s989_s19, 0 }
  0x48   : > { %229 = sbr.rel (%p994_p12) target bundleno = 321 (0x141), region = 32 }
  0x4f   : > { %750 = dma.done.wait (%p995_p0), [#allocation4], 256  }
  0x50   : > { %752 = vsyncadd (%p995_p0), [#allocation4], 4294967040  ;;  %s235_s29 = sand.u32 1, %s763_s13   ;;  %p996_p6 = scmp.ne.s32.totalorder %s990_s20, 0 }
  0x51   : > { %s563_s4 = sshll.u32 %s235_s29, 5  ;;  %s236_s6 = scalar_lea.sflag [#allocation6], %s235_s29 }
  0x52   : > { %s239_s9 = scalar_lea.vmem [#allocation5], %s563_s4 }
  0x53   : > { %754 = dma.done.wait (%p996_p6), %s236_s6, 512  }
  0x54   : > { %756 = vsyncadd (%p996_p6), %s236_s6, 4294966784  ;;  %vm300_vm0 = vcmask 261120   ;;  %v785_v0 = vmov 0.0   ;;  %v305_v1 = vld [vmem:[%s239_s9] sm:$0xff]  ;;  %v306_v2 = vld [vmem:[%s239_s9 + $0x8] sm:$0xff]  ;;  %p277_p7 = scmp.lt.s32.totalorder %s771_s15, 2 }
  0x55   : > { %302 = vst.msk [vmem:[#allocation2 + $0x8] sm:$0xff] %vm300_vm0, %v785_v0  ;;  %301 = vst.msk [vmem:[#allocation2] sm:$0xff] %vm300_vm0, %v785_v0  ;;  %v307_v3 = vld [vmem:[%s239_s9 + $0x10] sm:$0xff]  ;;  %v590_v4 = vpack.c.bf16 %v306_v2, %v305_v1  ;;  %v308_v5 = vld [vmem:[%s239_s9 + $0x18] sm:$0xff] }
  0x56   : > { %v303_v6 = vld [vmem:[#allocation3] sm:$0xff]  ;;  %v594_v7 = vpack.c.bf16 %v308_v5, %v307_v3  ;;  %v304_v8 = vld [vmem:[#allocation3 + $0x8] sm:$0xff]  ;;  %s1005_s15 = smov (!%p277_p7, %s771_s15), 2 }
  0x57   : > { %587 = vmatprep.mubr.msk.f32.mxu0 %vm300_vm0, %v303_v6  ;;  %591 = vmatprep.subr.bf16.mxu0 %v590_v4  ;;  %s282_s21 = scalar_lea.vmem %s983_s2, %s1005_s15  ;;  %s572_s7 = sshll.u32 %s1005_s15, 4 }
  0x58   : > { %593 = vmatpush3.bf16.msra.mxu0 %v590_v4  ;;  %v568_v15 = vld [vmem:[%s282_s21] ss:$0 sm:$0xff]  ;;  %s294_s30 = scalar_lea.vmem %s984_s3, %s572_s7 }
  0x59   : > { %595 = vmatprep.subr.bf16.mxu0 %v594_v7 }
  0x5c   : > { %597 = vmatpush3.bf16.msra.mxu0 %v594_v7  ;;  %v310_v9 = vld [vmem:[#allocation2 + $0x8] sm:$0xff]  ;;  %v309_v10 = vld [vmem:[#allocation2] sm:$0xff] }
  0x5f   : > { %588 = vmatmul.mubr.msk.f32.vlgmr.msra.gmra.mrb[0].mxu0 %vm300_vm0, %v304_v8 }
 0x132   : > { %v589_v11 = vpop.f32.mrb[0].mxu0 }
 0x133   : > { %v394_v12 = vadd.f32 %v589_v11, %v310_v9  ;;  %v384_v13 = vpop.f32.mrb[1].mxu0 }
 0x134   : > { %v393_v14 = vadd.f32 %v384_v13, %v309_v10 }
 0x135   : > { %396 = vst.msk [vmem:[#allocation2 + $0x8] sm:$0xff] %vm300_vm0, %v394_v12 }
 0x136   : > { %395 = vst.msk [vmem:[#allocation2] sm:$0xff] %vm300_vm0, %v393_v14 }
 0x13c   : > { %v401_v16 = vld [vmem:[#allocation2 + $0x8] sm:$0xff] }
 0x13d   : > { %v410_v17 = vadd.f32 %v568_v15, %v401_v16  ;;  %v400_v18 = vld [vmem:[#allocation2] sm:$0xff] }
 0x13e   : > { %v409_v19 = vadd.f32 %v568_v15, %v400_v18 }
 0x13f   : > { %412 = vst.msk [vmem:[%s294_s30 + $0x8] sm:$0xff] %vm300_vm0, %v410_v17 }
 0x140   : > { %411 = vst.msk [vmem:[%s294_s30] sm:$0xff] %vm300_vm0, %v409_v19 }
 0x141 PF: > { %s17_s17 = sadd.s32 1, %s779_s17   ;;  %s997_s12 = smov %s763_s13 }
 0x142   : > { %p14_p1 = scmp.ge.s32.totalorder %s17_s17, 5   ;;  %s998_s13 = smov %s767_s14 }
 0x143   : > { %s999_s14 = smov %s892_s26  ;;  %s1000_s15 = smov %s775_s16 }
 0x144   : > { %s1001_s16 = smov %s1003_s25  ;;  %16 = sbr.rel (!%p14_p1) target bundleno = 5 (0x5), region = 89 }
 0x14b   :  { %449 = vsyncpa [#allocation4], 1 }
 0x14c   :  { %451 = vsyncpa [#allocation4 + $0x1], 1 }
 0x14d   :  { %452 = vsyncpa [#allocation6], 1 }
 0x14e   :  { %454 = vsyncpa [#allocation6 + $0x1], 1 }

// kernel: multihead_attention.4
= control target key start
LH: loop header
LB: loop body
LE: loop exit
PB: predicated region body
PF: predicated region fallthrough
CT: control target
= control target key end

     0   :  { %s2351_s22 = smov 0   ;;  %s2353_s23 = smov 0   ;;  %s2595_s0 = inlined_call_operand.<no memory space> [shape: s32[1], index: 0, kind: input, shape index: {}, may-alias: {0,1}]   ;;  %s2596_s1 = inlined_call_operand.<no memory space> [shape: s32[1], index: 1, kind: input, shape index: {}, may-alias: {0,1}]   ;;  %s2597_s2 = inlined_call_operand.vmem [shape: f32[3,2,8,32], index: 2, kind: input, shape index: {}, may-alias: {2,3,4}]   ;;  %s2598_s3 = inlined_call_operand.vmem [shape: f32[3,2,8,32], index: 3, kind: input, shape index: {}, may-alias: {2,3,4}]   ;;  %s2599_s4 = inlined_call_operand.vmem [shape: f32[3,2,8,32], index: 4, kind: input, shape index: {}, may-alias: {2,3,4}]   ;;  %s2600_s5 = inlined_call_operand.vmem [shape: f32[2,8,32], index: 5, kind: output, shape index: {}]  }
   0x1   :  { %10 = sst [smem:[#allocation6]] %s2595_s0  ;;  %s2355_s24 = smov 0  }
   0x2   :  { %11 = sst [smem:[#allocation7]] %s2596_s1 }
   0x3 LB: > { %s29_s0 = sadd.s32 1, %s2289_s23  ;;  %p2033_p0 = scmp.ge.s32.totalorder %s2293_s24, 1  ;;  %s2293_s24 = sphi %s2355_s24, %s17_s24   ;;  %s2289_s23 = sphi %s2353_s23, %s2602_s23   ;;  %s2285_s22 = sphi %s2351_s22, %s2601_s22  }
   0x4   : > { %p31_p1 = scmp.ge.s32.totalorder %s29_s0, 2  ;;  %p203_p2 = scmp.lt.s32.totalorder %s2293_s24, 3 }
   0x6   : > { %s2604_s0 = smov (%p31_p1, %s29_s0), 0  ;;  %p204_p3 = pnand %p2033_p0, %p203_p2 }
   0x7   : > { %s2369_s1 = sld [smem:[#allocation6]] (!%p204_p3)  ;;  %p252_p4 = scmp.lt.s32.totalorder (!%p204_p3), %s2285_s22, 1 }
   0x8   : > { %207 = sbr.rel (%p204_p3) target bundleno = 2810 (0xafa), region = 32  ;;  %s2371_s25 = sld [smem:[#allocation7]] (!%p204_p3) }
   0xd   : > { %p254_p5 = scmp.lt.s32.totalorder (!%p204_p3), %s2369_s1, 0 }
   0xe   : > { %p263_p6 = scmp.lt.s32.totalorder (!%p204_p3), %s2371_s25, 0  ;;  %p2038_p7 = scmp.ne.s32.totalorder (!%p204_p3), %s2371_s25, 0 }
   0xf   : > { %s2606_s22 = smov (!%p252_p4, %s2285_s22), 1  ;;  %vm295_vm0 = vcmask (!%p2038_p7), 7168   ;;  %vm304_vm1 = vcmask (!%p2038_p7), 261120   ;;  %v2295_v0 = vmov (!%p2038_p7), -1e+30   ;;  %v2296_v1 = vmov (!%p2038_p7), 0.0  }
  0x10   : > { %s255_s26 = scalar_select %p254_p5, %s2369_s1, 0 }
  0x11   : > { %s264_s27 = scalar_select %p263_p6, %s2371_s25, 0 }
  0x12   : > { %s256_s28 = sadd.s32 %s255_s26, %s2606_s22  ;;  %294 = sbr.rel (%p2038_p7) target bundleno = 25 (0x19), region = 36  ;;  %296 = vst.msk [vmem:[#allocation2] sm:$0xff] (!%p2038_p7), %vm295_vm0, %v2295_v0  ;;  %297 = vst.msk [vmem:[#allocation2 + $0x8] sm:$0xff] (!%p2038_p7), %vm295_vm0, %v2295_v0 }
  0x13   : > { %s2034_s29 = sshll.u32 %s256_s28, 3  ;;  %s1971_s30 = sadd.s32 %s264_s27, %s2606_s22  ;;  %298 = vst.msk [vmem:[#allocation2 + $0x10] sm:$0xff] (!%p2038_p7), %vm295_vm0, %v2295_v0  ;;  %299 = vst.msk [vmem:[#allocation2 + $0x18] sm:$0xff] (!%p2038_p7), %vm295_vm0, %v2295_v0 }
  0x14   : > { %s2380_s8 = scalar_lea.vmem %s2597_s2, %s2034_s29  ;;  %s2035_s9 = sshll.u32 %s1971_s30, 3  ;;  %300 = vst.msk [vmem:[#allocation3] sm:$0xff] (!%p2038_p7), %vm295_vm0, %v2296_v1  ;;  %301 = vst.msk [vmem:[#allocation3 + $0x8] sm:$0xff] (!%p2038_p7), %vm295_vm0, %v2296_v1 }
  0x15   : > { %s2385_s12 = scalar_lea.vmem %s2598_s3, %s2035_s9  ;;  %s2390_s15 = scalar_lea.vmem %s2599_s4, %s2035_s9  ;;  %302 = vst.msk [vmem:[#allocation3 + $0x10] sm:$0xff] (!%p2038_p7), %vm295_vm0, %v2296_v1  ;;  %303 = vst.msk [vmem:[#allocation3 + $0x18] sm:$0xff] (!%p2038_p7), %vm295_vm0, %v2296_v1 }
  0x16   : > { %s2395_s18 = scalar_lea.vmem %s2600_s5, %s2034_s29  ;;  %305 = vst.msk [vmem:[#allocation4] sm:$0xff] (!%p2038_p7), %vm304_vm1, %v2296_v1 }
  0x19 PF: > { %p2039_p8 = scmp.ge.s32.totalorder %s2371_s25, %s2369_s1 }
  0x1a   : > { %v2040_v2 = vld [vmem:[%s2385_s12 + $0x10] sm:$0xff] (!%p2039_p8)  ;;  %vm313_vm2 = vcmask (!%p2039_p8), 64512   ;;  %v2297_v3 = vmov (!%p2039_p8), 0.0   ;;  %vm2298_vm3 = vmmov (!%p2039_p8), 0   ;;  %v310_v4 = vld [vmem:[%s2380_s8] sm:$0xff] (!%p2039_p8)  ;;  %v2299_v8 = vmov (!%p2039_p8), 0  }
  0x1b   : > { %309 = sbr.rel (%p2039_p8) target bundleno = 1431 (0x597), region = 40  ;;  %2103 = vmatprep.subr.mxu0 (!%p2039_p8), %v2297_v3  ;;  %2105 = vmatprep.mubr.msk.f32.mxu0 (!%p2039_p8), %vm2298_vm3, %v2297_v3  ;;  %s2300_s19 = smov (!%p2039_p8), 120   ;;  %v390_v9 = vld [vmem:[#allocation2] sm:$0xff] (!%p2039_p8)  ;;  %vm412_vm4 = vcmask (!%p2039_p8), 7168   ;;  %v576_v36 = vld [vmem:[#allocation2 + $0x8] sm:$0xff] (!%p2039_p8)  ;;  %v771_v39 = vld [vmem:[#allocation2 + $0x10] sm:$0xff] (!%p2039_p8) }
  0x1c   : > { %2104 = vmatpush3.xpose.msk.msra.mxu0 (!%p2039_p8), %vm313_vm2, %v2040_v2  ;;  %2108 = vmatprep.subr.mxu1 (!%p2039_p8), %v2297_v3  ;;  %s2301_s20 = smov (!%p2039_p8), 112   ;;  %s2302_s21 = smov (!%p2039_p8), 104   ;;  %v2422_v13 = vld [vmem:[%s2390_s15 + $0x20] sm:$0xff] (!%p2039_p8)  ;;  %v965_v42 = vld [vmem:[#allocation2 + $0x18] sm:$0xff] (!%p2039_p8)  ;;  %vm689_vm5 = vcmask (!%p2039_p8), 130112   ;;  %vm883_vm6 = vcmask (!%p2039_p8), 195712  }
  0x1d   : > { %2110 = vmatprep.mubr.msk.f32.mxu1 (!%p2039_p8), %vm2298_vm3, %v2297_v3  ;;  %2118 = vmatprep.subr.mxu0 (!%p2039_p8), %v2297_v3  ;;  %v487_v60 = vld [vmem:[#allocation4] sm:$0xff] (!%p2039_p8)  ;;  %s2303_s22 = smov (!%p2039_p8), 8   ;;  %s2304_s26 = smov (!%p2039_p8), 16   ;;  %vm1077_vm7 = vcmask (!%p2039_p8), 261312  }
  0x1e   : > { %2227 = vset.pattern.permute.xlu0 (!%p2039_p8), %v2299_v8  ;;  %2228 = vset.pattern.permute.xlu1 (!%p2039_p8), %v2299_v8  ;;  %s2305_s27 = smov (!%p2039_p8), 24  }
  0x1f   : > { %2106 = vmatmul.mubr.msk.f32.vlgmr.msra.gmra.mrb[0].mxu0 (!%p2039_p8), %vm313_vm2, %v310_v4  ;;  %499 = vrot.lane.b32.xlu1 (!%p2039_p8), %v2040_v2, %s2300_s19 }
  0x20   : > { %2120 = vmatprep.mubr.msk.f32.mxu0 (!%p2039_p8), %vm2298_vm3, %v2297_v3  ;;  %2109 = vmatpush3.msra.mxu1 (!%p2039_p8), %v2422_v13 }
  0x21   : > { %2113 = vmatprep.subr.mxu1 (!%p2039_p8), %v2297_v3 }
  0x23   : > { %497 = vrot.lane.b32.xlu1 %v310_v4, %s2300_s19 }
  0x27   : > { %694 = vrot.lane.b32.xlu1 %v2040_v2, %s2301_s20 }
  0x2b   : > { %692 = vrot.lane.b32.xlu1 %v310_v4, %s2301_s20 }
  0x2f   : > { %888 = vrot.lane.b32.xlu1 %v2040_v2, %s2302_s21 }
  0x33   : > { %886 = vrot.lane.b32.xlu1 %v310_v4, %s2302_s21 }
  0x91   : > { %v500_v14 = vpop.permute.xlu1 %499 }
  0x95   : > { %v498_v17 = vpop.permute.xlu1 %497 }
  0x99   : > { %v695_v19 = vpop.permute.xlu1 %694 }
  0x9d   : > { %v693_v20 = vpop.permute.xlu1 %692 }
  0xa1   : > { %v889_v22 = vpop.permute.xlu1 %888 }
  0xa5   : > { %v887_v23 = vpop.permute.xlu1 %886 }
  0xf2   : > { %v386_v5 = vpop.f32.mrb[0].mxu0 }
  0xf3   : > { %v2107_v6 = vpop.f32.mrb[1].mxu0  ;;  %v391_v7 = vsel %vm313_vm2, %v386_v5, -inf }
  0xf4   : > { %392 = vmax.xlane.f32.xlu0 %v391_v7 }
 0x181   : > { %v393_v10 = vpop.xlane.xlu0 %392 }
 0x182   : > { %v394_v11 = vmax.f32 %v390_v9, %v393_v10 }
 0x184   : > { %v395_v12 = vsub.f32 %v390_v9, %v394_v11  ;;  %496 = vst.msk [vmem:[#allocation2] sm:$0xff] %vm412_vm4, %v394_v11  ;;  %400 = vperm.xlu0 %2227, %v394_v11  }
 0x186   : > { %v396_v35 = vmul.f32 1.442695, %v395_v12 }
 0x203   : > { %v401_v15 = vpop.permute.xlu0 %400 }
 0x204   : > { %v403_v16 = vsub.f32 %v386_v5, %v401_v15 }
 0x206   : > { %v404_v18 = vmul.f32 1.442695, %v403_v16 }
 0x208   : > { %2229 = vpow2.f32 %v404_v18 }
 0x209   : > { %2231 = vpow2.f32 %v396_v35 }
 0x212   : > { %v2230_v21 = vpop.eup %2229 }
 0x213   : > { %2111 = vmatmul.mubr.msk.f32.vlgmr.msra.gmra.mrb[0].mxu1 %vm313_vm2, %v2230_v21  ;;  %v2232_v47 = vpop.eup %2231  ;;  %v408_v51 = vsel %vm313_vm2, %v2230_v21, 0.0 }
 0x214   : > { %2114 = vmatpush3.xpose.msk.msra.mxu1 %vm313_vm2, %v500_v14  ;;  %2115 = vmatprep.mubr.msk.f32.mxu1 %vm2298_vm3, %v2297_v3  ;;  %v406_v14 = vld [vmem:[#allocation3] sm:$0xff] }
 0x215   : > { %2123 = vmatprep.subr.mxu1 %v2297_v3  ;;  %v407_v15 = vmul.f32 %v2232_v47, %v406_v14 }
 0x217   : > { %2116 = vmatmul.mubr.msk.f32.vlgmr.msra.gmra.mrb[2].mxu1 %vm313_vm2, %v498_v17 }
 0x218   : > { %2124 = vmatpush3.xpose.msk.msra.mxu1 %vm313_vm2, %v695_v19  ;;  %2125 = vmatprep.mubr.msk.f32.mxu1 %vm2298_vm3, %v2297_v3  ;;  %v593_v19 = vld [vmem:[#allocation3 + $0x8] sm:$0xff] }
 0x219   : > { %2133 = vmatprep.subr.mxu1 %v2297_v3 }
 0x21b   : > { %2126 = vmatmul.mubr.msk.f32.vlgmr.msra.gmra.mrb[4].mxu1 %vm313_vm2, %v693_v20 }
 0x21c   : > { %2134 = vmatpush3.xpose.msk.msra.mxu1 %vm313_vm2, %v889_v22  ;;  %2135 = vmatprep.mubr.msk.f32.mxu1 %vm2298_vm3, %v2297_v3 }
 0x21f   : > { %2136 = vmatmul.mubr.msk.f32.vlgmr.msra.gmra.mrb[6].mxu1 %vm313_vm2, %v887_v23  ;;  %v788_v23 = vld [vmem:[#allocation3 + $0x10] sm:$0xff] }
 0x2e6   : > { %v2441_v24 = vpop.f32.mrb[0].mxu1 }
 0x2e7   : > { %v2112_v25 = vpop.f32.mrb[1].mxu1 }
 0x2ea   : > { %v571_v26 = vpop.f32.mrb[2].mxu1 }
 0x2eb   : > { %v2117_v27 = vpop.f32.mrb[3].mxu1  ;;  %v577_v28 = vsel %vm313_vm2, %v571_v26, -inf }
 0x2ec   : > { %578 = vmax.xlane.f32.xlu1 %v577_v28 }
 0x2ee   : > { %v766_v29 = vpop.f32.mrb[4].mxu1 }
 0x2ef   : > { %v2127_v30 = vpop.f32.mrb[5].mxu1  ;;  %v772_v31 = vsel %vm313_vm2, %v766_v29, -inf }
 0x2f0   : > { %773 = vmax.xlane.f32.xlu0 %v772_v31 }
 0x2f2   : > { %v960_v32 = vpop.f32.mrb[6].mxu1 }
 0x2f3   : > { %v966_v33 = vsel %vm313_vm2, %v960_v32, -inf  ;;  %v2137_v34 = vpop.f32.mrb[7].mxu1 }
 0x2f4   : > { %967 = vmax.xlane.f32.xlu1 %v966_v33 }
 0x379   : > { %v579_v37 = vpop.xlane.xlu1 %578 }
 0x37a   : > { %v580_v38 = vmax.f32 %v576_v36, %v579_v37 }
 0x37c   : > { %691 = vst.msk [vmem:[#allocation2 + $0x8] sm:$0xff] %vm412_vm4, %v580_v38  ;;  %586 = vperm.xlu1 %2228, %v580_v38   ;;  %v581_v50 = vsub.f32 %v576_v36, %v580_v38 }
 0x37d   : > { %v774_v40 = vpop.xlane.xlu0 %773 }
 0x37e   : > { %v775_v41 = vmax.f32 %v771_v39, %v774_v40  ;;  %v582_v52 = vmul.f32 1.442695, %v581_v50 }
 0x380   : > { %v776_v43 = vsub.f32 %v771_v39, %v775_v41  ;;  %885 = vst.msk [vmem:[#allocation2 + $0x10] sm:$0xff] %vm412_vm4, %v775_v41  ;;  %781 = vperm.xlu0 %2227, %v775_v41   ;;  %601 = vrot.lane.b32.xlu1 %v2422_v13, %s2300_s19 }
 0x381   : > { %v968_v44 = vpop.xlane.xlu1 %967 }
 0x382   : > { %v777_v45 = vmul.f32 1.442695, %v776_v43  ;;  %v969_v46 = vmax.f32 %v965_v42, %v968_v44 }
 0x384   : > { %2233 = vpow2.f32 %v777_v45  ;;  %v970_v48 = vsub.f32 %v965_v42, %v969_v46  ;;  %1079 = vst.msk [vmem:[#allocation2 + $0x18] sm:$0xff] %vm412_vm4, %v969_v46  ;;  %975 = vperm.xlu1 %2228, %v969_v46   ;;  %490 = vperm.xlu0 %2227, %v2232_v47   ;;  %v982_v42 = vld [vmem:[#allocation3 + $0x18] sm:$0xff] }
 0x385   : > { %2235 = vpow2.f32 %v582_v52 }
 0x386   : > { %v971_v12 = vmul.f32 1.442695, %v970_v48 }
 0x388   : > { %795 = vrot.lane.b32.xlu1 %v2422_v13, %s2301_s20 }
 0x38c   : > { %989 = vrot.lane.b32.xlu1 %v2422_v13, %s2302_s21 }
 0x38e   : > { %v2455_v49 = vpop.eup %2233 }
 0x38f   : > { %874 = vperm.xlu0 %2227, %v2455_v49   ;;  %v2236_v53 = vpop.eup %2235 }
 0x390   : > { %v594_v20 = vmul.f32 %v2236_v53, %v593_v19 }
 0x3b0   : > { %409 = vadd.xlane.f32.xlu1 %v408_v51 }
 0x3c1   : > { %680 = vperm.xlu1 %2228, %v2236_v53  }
 0x3fb   : > { %v587_v54 = vpop.permute.xlu1 %586 }
 0x3fc   : > { %v589_v55 = vsub.f32 %v571_v26, %v587_v54 }
 0x3fe   : > { %v590_v56 = vmul.f32 1.442695, %v589_v55 }
 0x3ff   : > { %v782_v57 = vpop.permute.xlu0 %781  ;;  %v602_v58 = vpop.permute.xlu1 %601 }
 0x400   : > { %2237 = vpow2.f32 %v590_v56  ;;  %v784_v59 = vsub.f32 %v766_v29, %v782_v57  ;;  %2119 = vmatpush3.msra.mxu0 %v602_v58 }
 0x401   : > { %2128 = vmatprep.subr.mxu0 %v2297_v3 }
 0x402   : > { %v785_v61 = vmul.f32 1.442695, %v784_v59 }
 0x403   : > { %v976_v62 = vpop.permute.xlu1 %975  ;;  %v491_v63 = vpop.permute.xlu0 %490 }
 0x404   : > { %2239 = vpow2.f32 %v785_v61  ;;  %v978_v0 = vsub.f32 %v960_v32, %v976_v62  ;;  %v493_v1 = vmul.f32 %v491_v63, %v487_v60 }
 0x406   : > { %v979_v2 = vmul.f32 1.442695, %v978_v0  ;;  %v494_v4 = vadd.f32 %v493_v1, %v2441_v24  ;;  %v789_v24 = vmul.f32 %v2455_v49, %v788_v23 }
 0x407   : > { %v796_v5 = vpop.permute.xlu1 %795 }
 0x408   : > { %2241 = vpow2.f32 %v979_v2  ;;  %495 = vst.msk [vmem:[#allocation4] sm:$0xff] %vm313_vm2, %v494_v4 }
 0x409   : > { %2243 = vpow2.f32 %v971_v12 }
 0x40a   : > { %v2238_v6 = vpop.eup %2237 }
 0x40b   : > { %2121 = vmatmul.mubr.msk.f32.vlgmr.msra.gmra.mrb[2].mxu0 %vm313_vm2, %v2238_v6  ;;  %v595_v7 = vsel %vm313_vm2, %v2238_v6, 0.0  ;;  %v990_v8 = vpop.permute.xlu1 %989 }
 0x40c   : > { %2129 = vmatpush3.msra.mxu0 %v796_v5  ;;  %596 = vadd.xlane.f32.xlu0 %v595_v7 }
 0x40d   : > { %2130 = vmatprep.mubr.msk.f32.mxu0 %vm2298_vm3, %v2297_v3  ;;  %2138 = vmatprep.subr.mxu0 %v2297_v3 }
 0x40e   : > { %v2240_v9 = vpop.eup %2239  ;;  %v875_v18 = vpop.permute.xlu0 %874 }
 0x40f   : > { %2131 = vmatmul.mubr.msk.f32.vlgmr.msra.gmra.mrb[4].mxu0 %vm313_vm2, %v2240_v9  ;;  %v790_v10 = vsel %vm313_vm2, %v2240_v9, 0.0  ;;  %v677_v34 = vld [vmem:[#allocation4] sm:$0xff] }
 0x410   : > { %791 = vadd.xlane.f32.xlu1 %v790_v10  ;;  %2139 = vmatpush3.msra.mxu0 %v990_v8 }
 0x411   : > { %2140 = vmatprep.mubr.msk.f32.mxu0 %vm2298_vm3, %v2297_v3 }
 0x412   : > { %v2242_v11 = vpop.eup %2241 }
 0x413   : > { %2141 = vmatmul.mubr.msk.f32.vlgmr.msra.gmra.mrb[6].mxu0 %vm313_vm2, %v2242_v11  ;;  %v2244_v13 = vpop.eup %2243  ;;  %v984_v33 = vsel %vm313_vm2, %v2242_v11, 0.0 }
 0x414   : > { %v983_v43 = vmul.f32 %v2244_v13, %v982_v42 }
 0x421   : > { %1068 = vperm.xlu1 %2228, %v2244_v13  }
 0x43d   : > { %v410_v16 = vpop.xlane.xlu1 %409 }
 0x43e   : > { %v411_v17 = vadd.f32 %v410_v16, %v407_v15 }
 0x440   : > { %413 = vst.msk [vmem:[#allocation3] sm:$0xff] %vm412_vm4, %v411_v17 }
 0x441   : > { %v681_v21 = vpop.permute.xlu1 %680 }
 0x442   : > { %v683_v35 = vmul.f32 %v681_v21, %v677_v34 }
 0x499   : > { %v597_v22 = vpop.xlane.xlu0 %596 }
 0x49a   : > { %v598_v3 = vadd.f32 %v597_v22, %v594_v20 }
 0x49c   : > { %599 = vst.msk [vmem:[#allocation3 + $0x8] sm:$0xff] %vm412_vm4, %v598_v3 }
 0x49d   : > { %v792_v25 = vpop.xlane.xlu1 %791 }
 0x49e   : > { %v793_v26 = vadd.f32 %v792_v25, %v789_v24 }
 0x4a0   : > { %794 = vst.msk [vmem:[#allocation3 + $0x10] sm:$0xff] %vm412_vm4, %v793_v26 }
 0x4a1   : > { %v1069_v47 = vpop.permute.xlu1 %1068 }
 0x4de   : > { %v673_v27 = vpop.f32.mrb[2].mxu0 }
 0x4df   : > { %685 = vrot.lane.b32.xlu0 %v673_v27, %s2303_s22  ;;  %v2122_v28 = vpop.f32.mrb[3].mxu0 }
 0x4e2   : > { %v867_v29 = vpop.f32.mrb[4].mxu0 }
 0x4e3   : > { %879 = vrot.lane.b32.xlu0 %v867_v29, %s2304_s26  ;;  %v2132_v30 = vpop.f32.mrb[5].mxu0 }
 0x4e6   : > { %v1061_v31 = vpop.f32.mrb[6].mxu0 }
 0x4e7   : > { %v2142_v32 = vpop.f32.mrb[7].mxu0 }
 0x502   : > { %985 = vadd.xlane.f32.xlu0 %v984_v33 }
 0x518   : > { %1073 = vrot.lane.b32.xlu0 %v1061_v31, %s2305_s27 }
 0x551   : > { %v686_v36 = vpop.permute.xlu0 %685 }
 0x552   : > { %v688_v37 = vadd.f32 %v686_v36, %v683_v35 }
 0x554   : > { %690 = vst.msk [vmem:[#allocation4] sm:$0xff] %vm689_vm5, %v688_v37 }
 0x555   : > { %v880_v40 = vpop.permute.xlu0 %879 }
 0x55b   : > { %v871_v38 = vld [vmem:[#allocation4] sm:$0xff] }
 0x55c   : > { %v877_v39 = vmul.f32 %v875_v18, %v871_v38 }
 0x55e   : > { %v882_v41 = vadd.f32 %v880_v40, %v877_v39 }
 0x560   : > { %884 = vst.msk [vmem:[#allocation4] sm:$0xff] %vm883_vm6, %v882_v41 }
 0x567   : > { %v1065_v45 = vld [vmem:[#allocation4] sm:$0xff] }
 0x568   : > { %v1071_v48 = vmul.f32 %v1069_v47, %v1065_v45 }
 0x58f   : > { %v986_v44 = vpop.xlane.xlu0 %985 }
 0x590   : > { %v987_v46 = vadd.f32 %v986_v44, %v983_v43 }
 0x592   : > { %988 = vst.msk [vmem:[#allocation3 + $0x18] sm:$0xff] %vm412_vm4, %v987_v46 }
 0x593   : > { %v1074_v49 = vpop.permute.xlu0 %1073 }
 0x594   : > { %v1076_v50 = vadd.f32 %v1074_v49, %v1071_v48 }
 0x596   : > { %1078 = vst.msk [vmem:[#allocation4] sm:$0xff] %vm1077_vm7, %v1076_v50 }
 0x597 PF: > { %p2054_p9 = scmp.ne.s32.totalorder %s2371_s25, %s2369_s1 }
 0x598   : > { %v2055_v51 = vld [vmem:[%s2385_s12 + $0x10] sm:$0xff] (!%p2054_p9)  ;;  %vm1092_vm8 = vcmask (!%p2054_p9), 64512   ;;  %v2306_v52 = vmov (!%p2054_p9), 0.0   ;;  %vm2307_vm9 = vmmov (!%p2054_p9), 0   ;;  %v1084_v53 = vld [vmem:[%s2380_s8] sm:$0xff] (!%p2054_p9)  ;;  %v1087_v54 = vlaneseq (!%p2054_p9)  ;;  %s2309_s1 = smov (!%p2054_p9), 120  }
 0x599   : > { %1083 = sbr.rel (%p2054_p9) target bundleno = 2810 (0xafa), region = 44  ;;  %2143 = vmatprep.subr.mxu0 (!%p2054_p9), %v2306_v52  ;;  %2145 = vmatprep.mubr.msk.f32.mxu0 (!%p2054_p9), %vm2307_vm9, %v2306_v52  ;;  %v2308_v61 = vmov (!%p2054_p9), 0   ;;  %s2310_s25 = smov (!%p2054_p9), 112   ;;  %v1170_v62 = vld [vmem:[#allocation2] sm:$0xff] (!%p2054_p9)  ;;  %vm1192_vm11 = vcmask (!%p2054_p9), 7168   ;;  %v1357_v28 = vld [vmem:[#allocation2 + $0x8] sm:$0xff] (!%p2054_p9) }
 0x59a   : > { %2144 = vmatpush3.xpose.msk.msra.mxu0 (!%p2054_p9), %vm1092_vm8, %v2055_v51  ;;  %2148 = vmatprep.subr.mxu1 (!%p2054_p9), %v2306_v52  ;;  %v2493_v55 = vshrl.u32 (!%p2054_p9), %v1087_v54, 7  ;;  %v2495_v56 = vand.u32 (!%p2054_p9), 127, %v1087_v54  ;;  %s2311_s28 = smov (!%p2054_p9), 104   ;;  %v2511_v2 = vld [vmem:[%s2390_s15 + $0x20] sm:$0xff] (!%p2054_p9)  ;;  %v2542_v31 = vld [vmem:[#allocation2 + $0x10] sm:$0xff] (!%p2054_p9)  ;;  %v2546_v35 = vld [vmem:[#allocation2 + $0x18] sm:$0xff] (!%p2054_p9) }
 0x59b   : > { %2150 = vmatprep.mubr.msk.f32.mxu1 (!%p2054_p9), %vm2307_vm9, %v2306_v52  ;;  %2158 = vmatprep.subr.mxu0 (!%p2054_p9), %v2306_v52  ;;  %s2312_s29 = smov (!%p2054_p9), 8   ;;  %s2313_s30 = smov (!%p2054_p9), 16   ;;  %vm1470_vm12 = vcmask (!%p2054_p9), 130112   ;;  %vm1665_vm13 = vcmask (!%p2054_p9), 195712   ;;  %vm1860_vm14 = vcmask (!%p2054_p9), 261312  }
 0x59c   : > { %vm1091_vm10 = vcmp.ge.s32.totalorder (!%p2054_p9), %v2493_v55, %v2495_v56  ;;  %2245 = vset.pattern.permute.xlu0 (!%p2054_p9), %v2308_v61  ;;  %2246 = vset.pattern.permute.xlu1 (!%p2054_p9), %v2308_v61  ;;  %s2314_s6 = smov (!%p2054_p9), 24  }
 0x59d   : > { %2146 = vmatmul.mubr.msk.f32.vlgmr.msra.gmra.mrb[0].mxu0 (!%p2054_p9), %vm1092_vm8, %v1084_v53  ;;  %1279 = vrot.lane.b32.xlu1 (!%p2054_p9), %v2055_v51, %s2309_s1  ;;  %v1267_v48 = vld [vmem:[#allocation4] sm:$0xff] (!%p2054_p9) }
 0x59e   : > { %2160 = vmatprep.mubr.msk.f32.mxu0 (!%p2054_p9), %vm2307_vm9, %v2306_v52  ;;  %2149 = vmatpush3.msra.mxu1 (!%p2054_p9), %v2511_v2 }
 0x59f   : > { %2153 = vmatprep.subr.mxu1 (!%p2054_p9), %v2306_v52 }
 0x5a1   : > { %1277 = vrot.lane.b32.xlu1 %v1084_v53, %s2309_s1 }
 0x5a5   : > { %1475 = vrot.lane.b32.xlu1 %v2055_v51, %s2310_s25 }
 0x5a9   : > { %1473 = vrot.lane.b32.xlu1 %v1084_v53, %s2310_s25 }
 0x5ad   : > { %1670 = vrot.lane.b32.xlu1 %v2055_v51, %s2311_s28 }
 0x5b1   : > { %1668 = vrot.lane.b32.xlu1 %v1084_v53, %s2311_s28 }
 0x60f   : > { %v1280_v4 = vpop.permute.xlu1 %1279 }
 0x613   : > { %v1278_v7 = vpop.permute.xlu1 %1277 }
 0x617   : > { %v1476_v9 = vpop.permute.xlu1 %1475 }
 0x61b   : > { %v1474_v10 = vpop.permute.xlu1 %1473 }
 0x61f   : > { %v1671_v12 = vpop.permute.xlu1 %1670 }
 0x623   : > { %v1669_v13 = vpop.permute.xlu1 %1668 }
 0x670   : > { %v1165_v57 = vpop.f32.mrb[0].mxu0 }
 0x671   : > { %v1169_v58 = vsel %vm1091_vm10, %v1165_v57, -1e+30  ;;  %v2147_v59 = vpop.f32.mrb[1].mxu0 }
 0x672   : > { %v1171_v60 = vsel %vm1092_vm8, %v1169_v58, -inf }
 0x673   : > { %1172 = vmax.xlane.f32.xlu0 %v1171_v60 }
 0x700   : > { %v1173_v63 = vpop.xlane.xlu0 %1172 }
 0x701   : > { %v1174_v0 = vmax.f32 %v1170_v62, %v1173_v63 }
 0x703   : > { %v1175_v1 = vsub.f32 %v1170_v62, %v1174_v0  ;;  %1276 = vst.msk [vmem:[#allocation2] sm:$0xff] %vm1192_vm11, %v1174_v0  ;;  %1180 = vperm.xlu0 %2245, %v1174_v0  }
 0x705   : > { %v1176_v27 = vmul.f32 1.442695, %v1175_v1 }
 0x782   : > { %v1181_v5 = vpop.permute.xlu0 %1180 }
 0x783   : > { %v1183_v6 = vsub.f32 %v1169_v58, %v1181_v5 }
 0x785   : > { %v1184_v8 = vmul.f32 1.442695, %v1183_v6  ;;  %v1186_v6 = vld [vmem:[#allocation3] sm:$0xff] }
 0x787   : > { %2247 = vpow2.f32 %v1184_v8 }
 0x788   : > { %2249 = vpow2.f32 %v1176_v27 }
 0x791   : > { %v2248_v11 = vpop.eup %2247 }
 0x792   : > { %2151 = vmatmul.mubr.msk.f32.vlgmr.msra.gmra.mrb[0].mxu1 %vm1092_vm8, %v2248_v11  ;;  %v2250_v39 = vpop.eup %2249  ;;  %v1188_v41 = vsel %vm1092_vm8, %v2248_v11, 0.0 }
 0x793   : > { %2154 = vmatpush3.xpose.msk.msra.mxu1 %vm1092_vm8, %v1280_v4  ;;  %2155 = vmatprep.mubr.msk.f32.mxu1 %vm2307_vm9, %v2306_v52 }
 0x794   : > { %2163 = vmatprep.subr.mxu1 %v2306_v52 }
 0x796   : > { %2156 = vmatmul.mubr.msk.f32.vlgmr.msra.gmra.mrb[2].mxu1 %vm1092_vm8, %v1278_v7  ;;  %v1187_v7 = vmul.f32 %v2250_v39, %v1186_v6 }
 0x797   : > { %2164 = vmatpush3.xpose.msk.msra.mxu1 %vm1092_vm8, %v1476_v9  ;;  %2165 = vmatprep.mubr.msk.f32.mxu1 %vm2307_vm9, %v2306_v52 }
 0x798   : > { %2173 = vmatprep.subr.mxu1 %v2306_v52 }
 0x79a   : > { %2166 = vmatmul.mubr.msk.f32.vlgmr.msra.gmra.mrb[4].mxu1 %vm1092_vm8, %v1474_v10  ;;  %v1374_v10 = vld [vmem:[#allocation3 + $0x8] sm:$0xff] }
 0x79b   : > { %2174 = vmatpush3.xpose.msk.msra.mxu1 %vm1092_vm8, %v1671_v12  ;;  %2175 = vmatprep.mubr.msk.f32.mxu1 %vm2307_vm9, %v2306_v52 }
 0x79e   : > { %2176 = vmatmul.mubr.msk.f32.vlgmr.msra.gmra.mrb[6].mxu1 %vm1092_vm8, %v1669_v13  ;;  %v1570_v13 = vld [vmem:[#allocation3 + $0x10] sm:$0xff] }
 0x865   : > { %v1263_v14 = vpop.f32.mrb[0].mxu1 }
 0x866   : > { %v2152_v15 = vpop.f32.mrb[1].mxu1 }
 0x869   : > { %v1351_v16 = vpop.f32.mrb[2].mxu1 }
 0x86a   : > { %v1355_v17 = vsel %vm1091_vm10, %v1351_v16, -1e+30  ;;  %v2157_v18 = vpop.f32.mrb[3].mxu1 }
 0x86b   : > { %v1358_v19 = vsel %vm1092_vm8, %v1355_v17, -inf  ;;  %v1765_v18 = vld [vmem:[#allocation3 + $0x18] sm:$0xff] }
 0x86c   : > { %1359 = vmax.xlane.f32.xlu1 %v1358_v19 }
 0x86d   : > { %v1547_v20 = vpop.f32.mrb[4].mxu1 }
 0x86e   : > { %v1551_v21 = vsel %vm1091_vm10, %v1547_v20, -1e+30  ;;  %v2167_v22 = vpop.f32.mrb[5].mxu1 }
 0x86f   : > { %v1554_v23 = vsel %vm1092_vm8, %v1551_v21, -inf }
 0x870   : > { %1555 = vmax.xlane.f32.xlu0 %v1554_v23 }
 0x871   : > { %v1742_v3 = vpop.f32.mrb[6].mxu1 }
 0x872   : > { %v1746_v24 = vsel %vm1091_vm10, %v1742_v3, -1e+30  ;;  %v2177_v25 = vpop.f32.mrb[7].mxu1 }
 0x873   : > { %v1749_v26 = vsel %vm1092_vm8, %v1746_v24, -inf }
 0x874   : > { %1750 = vmax.xlane.f32.xlu1 %v1749_v26 }
 0x8f9   : > { %v1360_v29 = vpop.xlane.xlu1 %1359 }
 0x8fa   : > { %v1361_v30 = vmax.f32 %v1357_v28, %v1360_v29 }
 0x8fc   : > { %v1362_v32 = vsub.f32 %v1357_v28, %v1361_v30  ;;  %1472 = vst.msk [vmem:[#allocation2 + $0x8] sm:$0xff] %vm1192_vm11, %v1361_v30  ;;  %1367 = vperm.xlu1 %2246, %v1361_v30  }
 0x8fd   : > { %v1556_v33 = vpop.xlane.xlu0 %1555 }
 0x8fe   : > { %v1557_v34 = vmax.f32 %v2542_v31, %v1556_v33  ;;  %v1363_v0 = vmul.f32 1.442695, %v1362_v32 }
 0x900   : > { %v1558_v36 = vsub.f32 %v2542_v31, %v1557_v34  ;;  %1667 = vst.msk [vmem:[#allocation2 + $0x10] sm:$0xff] %vm1192_vm11, %v1557_v34  ;;  %1563 = vperm.xlu0 %2245, %v1557_v34   ;;  %1382 = vrot.lane.b32.xlu1 %v2511_v2, %s2309_s1 }
 0x901   : > { %v1751_v37 = vpop.xlane.xlu1 %1750 }
 0x902   : > { %v1752_v38 = vmax.f32 %v2546_v35, %v1751_v37 }
 0x904   : > { %v1753_v40 = vsub.f32 %v2546_v35, %v1752_v38  ;;  %1862 = vst.msk [vmem:[#allocation2 + $0x18] sm:$0xff] %vm1192_vm11, %v1752_v38  ;;  %1758 = vperm.xlu1 %2246, %v1752_v38   ;;  %1270 = vperm.xlu0 %2245, %v2250_v39  }
 0x908   : > { %1577 = vrot.lane.b32.xlu1 %v2511_v2, %s2310_s25 }
 0x90c   : > { %1772 = vrot.lane.b32.xlu1 %v2511_v2, %s2311_s28  ;;  %v1559_v2 = vmul.f32 1.442695, %v1558_v36 }
 0x930   : > { %1189 = vadd.xlane.f32.xlu1 %v1188_v41 }
 0x97b   : > { %v1368_v42 = vpop.permute.xlu1 %1367 }
 0x97c   : > { %v1370_v43 = vsub.f32 %v1355_v17, %v1368_v42 }
 0x97e   : > { %v1371_v44 = vmul.f32 1.442695, %v1370_v43 }
 0x97f   : > { %v1564_v45 = vpop.permute.xlu0 %1563  ;;  %v1383_v46 = vpop.permute.xlu1 %1382 }
 0x980   : > { %2251 = vpow2.f32 %v1371_v44  ;;  %v1566_v47 = vsub.f32 %v1551_v21, %v1564_v45  ;;  %2159 = vmatpush3.msra.mxu0 %v1383_v46 }
 0x981   : > { %2168 = vmatprep.subr.mxu0 %v2306_v52 }
 0x982   : > { %v1567_v49 = vmul.f32 1.442695, %v1566_v47 }
 0x983   : > { %v1759_v50 = vpop.permute.xlu1 %1758  ;;  %v1271_v51 = vpop.permute.xlu0 %1270 }
 0x984   : > { %2253 = vpow2.f32 %v1567_v49  ;;  %v1761_v53 = vsub.f32 %v1746_v24, %v1759_v50  ;;  %v1273_v54 = vmul.f32 %v1271_v51, %v1267_v48 }
 0x986   : > { %v1762_v55 = vmul.f32 1.442695, %v1761_v53  ;;  %v1274_v56 = vadd.f32 %v1273_v54, %v1263_v14 }
 0x987   : > { %v1578_v57 = vpop.permute.xlu1 %1577 }
 0x988   : > { %2255 = vpow2.f32 %v1762_v55  ;;  %1275 = vst.msk [vmem:[#allocation4] sm:$0xff] %vm1092_vm8, %v1274_v56 }
 0x989   : > { %2257 = vpow2.f32 %v1363_v0 }
 0x98a   : > { %v2252_v58 = vpop.eup %2251  ;;  %2259 = vpow2.f32 %v1559_v2 }
 0x98b   : > { %2161 = vmatmul.mubr.msk.f32.vlgmr.msra.gmra.mrb[2].mxu0 %vm1092_vm8, %v2252_v58  ;;  %v1376_v59 = vsel %vm1092_vm8, %v2252_v58, 0.0  ;;  %v1773_v60 = vpop.permute.xlu1 %1772 }
 0x98c   : > { %1377 = vadd.xlane.f32.xlu0 %v1376_v59  ;;  %2169 = vmatpush3.msra.mxu0 %v1578_v57 }
 0x98d   : > { %2170 = vmatprep.mubr.msk.f32.mxu0 %vm2307_vm9, %v2306_v52  ;;  %2178 = vmatprep.subr.mxu0 %v2306_v52 }
 0x98e   : > { %v2254_v61 = vpop.eup %2253 }
 0x98f   : > { %2171 = vmatmul.mubr.msk.f32.vlgmr.msra.gmra.mrb[4].mxu0 %vm1092_vm8, %v2254_v61  ;;  %v1572_v62 = vsel %vm1092_vm8, %v2254_v61, 0.0  ;;  %v1458_v49 = vld [vmem:[#allocation4] sm:$0xff] }
 0x990   : > { %1573 = vadd.xlane.f32.xlu1 %v1572_v62  ;;  %2179 = vmatpush3.msra.mxu0 %v1773_v60 }
 0x991   : > { %2180 = vmatprep.mubr.msk.f32.mxu0 %vm2307_vm9, %v2306_v52  ;;  %v1754_v52 = vmul.f32 1.442695, %v1753_v40 }
 0x992   : > { %v2256_v63 = vpop.eup %2255 }
 0x993   : > { %2181 = vmatmul.mubr.msk.f32.vlgmr.msra.gmra.mrb[6].mxu0 %vm1092_vm8, %v2256_v63  ;;  %v1767_v1 = vsel %vm1092_vm8, %v2256_v63, 0.0  ;;  %v2258_v4 = vpop.eup %2257  ;;  %2261 = vpow2.f32 %v1754_v52 }
 0x994   : > { %1768 = vadd.xlane.f32.xlu0 %v1767_v1  ;;  %v2260_v5 = vpop.eup %2259  ;;  %v1375_v11 = vmul.f32 %v2258_v4, %v1374_v10 }
 0x995   : > { %v1571_v15 = vmul.f32 %v2260_v5, %v1570_v13 }
 0x99d   : > { %v2262_v16 = vpop.eup %2261 }
 0x99e   : > { %v1766_v20 = vmul.f32 %v2262_v16, %v1765_v18 }
 0x9a1   : > { %1461 = vperm.xlu1 %2246, %v2258_v4  }
 0x9a5   : > { %1656 = vperm.xlu1 %2246, %v2260_v5  }
 0x9bd   : > { %v1190_v8 = vpop.xlane.xlu1 %1189 }
 0x9be   : > { %v1191_v9 = vadd.f32 %v1190_v8, %v1187_v7 }
 0x9c0   : > { %1193 = vst.msk [vmem:[#allocation3] sm:$0xff] %vm1192_vm11, %v1191_v9 }
 0x9c7   : > { %v1863_v23 = vld [vmem:[#allocation3] sm:$0xff] }
 0x9c8   : > { %2263 = vrcp.f32 %v1863_v23 }
 0x9d2   : > { %v2264_v26 = vpop.eup %2263 }
 0x9d3   : > { %v1865_v28 = vmul.f32 %v2264_v26, %v1863_v23 }
 0x9d5   : > { %v1866_v32 = vsub.f32 2.0, %v1865_v28 }
 0x9d7   : > { %v1867_v38 = vmul.f32 %v2264_v26, %v1866_v32 }
 0xa19   : > { %v1378_v12 = vpop.xlane.xlu0 %1377 }
 0xa1a   : > { %v1379_v14 = vadd.f32 %v1378_v12, %v1375_v11 }
 0xa1c   : > { %1380 = vst.msk [vmem:[#allocation3 + $0x8] sm:$0xff] %vm1192_vm11, %v1379_v14 }
 0xa1d   : > { %v1574_v17 = vpop.xlane.xlu1 %1573 }
 0xa1e   : > { %v1575_v19 = vadd.f32 %v1574_v17, %v1571_v15 }
 0xa20   : > { %1576 = vst.msk [vmem:[#allocation3 + $0x10] sm:$0xff] %vm1192_vm11, %v1575_v19 }
 0xa21   : > { %v1769_v21 = vpop.xlane.xlu0 %1768  ;;  %v1462_v48 = vpop.permute.xlu1 %1461 }
 0xa22   : > { %v1770_v22 = vadd.f32 %v1769_v21, %v1766_v20  ;;  %v1464_v50 = vmul.f32 %v1462_v48, %v1458_v49 }
 0xa23   : > { %v1876_v3 = vld [vmem:[#allocation3 + $0x8] sm:$0xff] }
 0xa24   : > { %1771 = vst.msk [vmem:[#allocation3 + $0x18] sm:$0xff] %vm1192_vm11, %v1770_v22  ;;  %2265 = vrcp.f32 %v1876_v3 }
 0xa25   : > { %v1657_v54 = vpop.permute.xlu1 %1656 }
 0xa27   : > { %v1889_v24 = vld [vmem:[#allocation3 + $0x10] sm:$0xff] }
 0xa28   : > { %2267 = vrcp.f32 %v1889_v24 }
 0xa2b   : > { %v1902_v25 = vld [vmem:[#allocation3 + $0x18] sm:$0xff] }
 0xa2c   : > { %2269 = vrcp.f32 %v1902_v25 }
 0xa2e   : > { %v2266_v27 = vpop.eup %2265 }
 0xa2f   : > { %v1878_v34 = vmul.f32 %v2266_v27, %v1876_v3 }
 0xa31   : > { %v1879_v40 = vsub.f32 2.0, %v1878_v34 }
 0xa32   : > { %v2268_v29 = vpop.eup %2267 }
 0xa33   : > { %v1891_v33 = vmul.f32 %v2268_v29, %v1889_v24  ;;  %v1880_v45 = vmul.f32 %v2266_v27, %v1879_v40 }
 0xa35   : > { %v1892_v39 = vsub.f32 2.0, %v1891_v33 }
 0xa36   : > { %v2270_v35 = vpop.eup %2269 }
 0xa37   : > { %v1904_v41 = vmul.f32 %v2270_v35, %v1902_v25  ;;  %v1893_v44 = vmul.f32 %v2268_v29, %v1892_v39 }
 0xa39   : > { %v1905_v46 = vsub.f32 2.0, %v1904_v41 }
 0xa3b   : > { %v1906_v47 = vmul.f32 %v2270_v35, %v1905_v46 }
 0xa5e   : > { %v1454_v30 = vpop.f32.mrb[2].mxu0 }
 0xa5f   : > { %1466 = vrot.lane.b32.xlu0 %v1454_v30, %s2312_s29  ;;  %v2162_v31 = vpop.f32.mrb[3].mxu0 }
 0xa62   : > { %v1649_v36 = vpop.f32.mrb[4].mxu0 }
 0xa63   : > { %1851 = vperm.xlu0 %2245, %v2262_v16   ;;  %1661 = vrot.lane.b32.xlu1 %v1649_v36, %s2313_s30  ;;  %v2172_v37 = vpop.f32.mrb[5].mxu0 }
 0xa66   : > { %v1844_v42 = vpop.f32.mrb[6].mxu0 }
 0xa67   : > { %1871 = vperm.xlu0 %2245, %v1867_v38   ;;  %1856 = vrot.lane.b32.xlu1 %v1844_v42, %s2314_s6  ;;  %v2182_v43 = vpop.f32.mrb[7].mxu0 }
 0xa6b   : > { %1897 = vperm.xlu0 %2245, %v1893_v44   ;;  %1884 = vperm.xlu1 %2246, %v1880_v45  }
 0xa6f   : > { %1910 = vperm.xlu1 %2246, %v1906_v47  }
 0xad1   : > { %v1467_v51 = vpop.permute.xlu0 %1466 }
 0xad2   : > { %v1469_v53 = vadd.f32 %v1467_v51, %v1464_v50 }
 0xad4   : > { %1471 = vst.msk [vmem:[#allocation4] sm:$0xff] %vm1470_vm12, %v1469_v53 }
 0xad5   : > { %v1662_v57 = vpop.permute.xlu1 %1661 }
 0xad9   : > { %v1857_v62 = vpop.permute.xlu1 %1856 }
 0xadb   : > { %v1653_v55 = vld [vmem:[#allocation4] sm:$0xff] }
 0xadc   : > { %v1659_v56 = vmul.f32 %v1657_v54, %v1653_v55 }
 0xade   : > { %v1664_v58 = vadd.f32 %v1662_v57, %v1659_v56 }
 0xae0   : > { %1666 = vst.msk [vmem:[#allocation4] sm:$0xff] %vm1665_vm13, %v1664_v58 }
 0xae2   : > { %v1852_v59 = vpop.permute.xlu0 %1851 }
 0xae6   : > { %v1872_v0 = vpop.permute.xlu0 %1871 }
 0xae7   : > { %v1848_v60 = vld [vmem:[#allocation4] sm:$0xff] }
 0xae8   : > { %v1854_v61 = vmul.f32 %v1852_v59, %v1848_v60 }
 0xaea   : > { %v1859_v63 = vadd.f32 %v1857_v62, %v1854_v61  ;;  %v1885_v1 = vpop.permute.xlu1 %1884  ;;  %v1898_v6 = vpop.permute.xlu0 %1897 }
 0xaec   : > { %1861 = vst.msk [vmem:[#allocation4] sm:$0xff] %vm1860_vm14, %v1859_v63 }
 0xaee   : > { %v1911_v8 = vpop.permute.xlu1 %1910 }
 0xaf3   : > { %v1868_v2 = vld [vmem:[#allocation4] sm:$0xff] }
 0xaf4   : > { %v1874_v4 = vmul.f32 %v1872_v0, %v1868_v2  ;;  %v1887_v5 = vmul.f32 %v1885_v1, %v1868_v2  ;;  %v1900_v7 = vmul.f32 %v1898_v6, %v1868_v2  ;;  %v1913_v9 = vmul.f32 %v1911_v8, %v1868_v2 }
 0xaf6   : > { %1875 = vst.msk [vmem:[%s2395_s18] sm:$0xff] %vm1092_vm8, %v1874_v4 }
 0xaf7   : > { %1888 = vst.msk [vmem:[%s2395_s18] sm:$0xff] %vm1470_vm12, %v1887_v5 }
 0xaf8   : > { %1901 = vst.msk [vmem:[%s2395_s18] sm:$0xff] %vm1665_vm13, %v1900_v7 }
 0xaf9   : > { %1914 = vst.msk [vmem:[%s2395_s18] sm:$0xff] %vm1860_vm14, %v1913_v9 }
 0xafa PF: > { %s17_s24 = sadd.s32 1, %s2293_s24   ;;  %s2601_s22 = smov %s2289_s23 }
 0xafb   : > { %p14_p10 = scmp.ge.s32.totalorder %s17_s24, 4   ;;  %s2602_s23 = smov %s2604_s0 }
 0xafd   :  { %16 = sbr.rel (!%p14_p10) target bundleno = 3 (0x3), region = 92 }

</bundles_post_ra>
